<compile_context>
chip_gen: v7x
topology: tpu7x:2x2x1
jax: 0.10.0
libtpu: 0.0.40
codegen_flags: <defaults>
</compile_context>

<pallas_src>
import jax
import jax.numpy as jnp
from jax.experimental import pallas as pl
from jax.experimental.pallas import tpu as pltpu

NB_INPUT = 15
HID = 3
NB_LAYER = 2                       # number of repeated hidden blocks
HIDDEN = NB_INPUT * HID            # 45
EPS = 1e-5
HP = jax.lax.Precision.HIGHEST     # true-f32 matmuls on the MXU (kernel + reference)


def _batchnorm(h, gamma, beta):
    """Training-mode BatchNorm1d over the batch (lane) axis, biased variance.

    One-pass variance (E[x^2] - mean^2) saves a full VPU pass over (F, B)."""
    mean = jnp.mean(h, axis=1, keepdims=True)                       # (F, 1)
    var = jnp.mean(h * h, axis=1, keepdims=True) - mean * mean      # (F, 1)
    var = jnp.maximum(var, 0.0)                                     # guard f32 rounding
    return (h - mean) * jax.lax.rsqrt(var + EPS) * gamma + beta


def mlp_kernel(x_ref,
               w0_ref, b0_ref, g0_ref, be0_ref,
               wh_ref, bh_ref, gh_ref, beh_ref,
               w1_ref, b1_ref, g1_ref, be1_ref,
               w2_ref, b2_ref,
               out_ref):
    x = x_ref[...]                                                  # (15, B)

    # block 0: Linear(15 -> 45) + ReLU + BN(45)
    h = jnp.dot(w0_ref[...], x, precision=HP,
                preferred_element_type=jnp.float32) + b0_ref[...]
    h = jnp.maximum(h, 0.0)
    h = _batchnorm(h, g0_ref[...], be0_ref[...])

    # nbLayer repeated blocks: Linear(45 -> 45) + ReLU + BN(45)
    for l in range(NB_LAYER):                                       # static unroll (small, fixed)
        h = jnp.dot(wh_ref[l], h, precision=HP,
                    preferred_element_type=jnp.float32) + bh_ref[l]
        h = jnp.maximum(h, 0.0)
        h = _batchnorm(h, gh_ref[l], beh_ref[l])

    # contraction block: Linear(45 -> 15) + ReLU + BN(15)
    h = jnp.dot(w1_ref[...], h, precision=HP,
                preferred_element_type=jnp.float32) + b1_ref[...]
    h = jnp.maximum(h, 0.0)
    h = _batchnorm(h, g1_ref[...], be1_ref[...])

    # head Linear(15 -> 1): VPU multiply + sublane reduce (XLU) instead of an
    # N=1 MXU matmul; result is a lane-dense (1, B) row.
    out_ref[...] = jnp.sum(h * w2_ref[...], axis=0, keepdims=True) + b2_ref[...]


def init_params(key):
    """Deterministic synthetic parameters (PyTorch-like uniform fan-in init)."""
    def linear(key, fan_in, fan_out):
        k1, k2 = jax.random.split(key)
        bound = 1.0 / (fan_in ** 0.5)
        w = jax.random.uniform(k1, (fan_out, fan_in), jnp.float32, -bound, bound)
        b = jax.random.uniform(k2, (fan_out, 1), jnp.float32, -bound, bound)
        return w, b

    keys = jax.random.split(key, 4 + NB_LAYER)
    w0, b0 = linear(keys[0], NB_INPUT, HIDDEN)                      # (45,15), (45,1)
    g0 = jnp.ones((HIDDEN, 1), jnp.float32)
    be0 = jnp.zeros((HIDDEN, 1), jnp.float32)

    whs, bhs = [], []
    for l in range(NB_LAYER):
        w, b = linear(keys[1 + l], HIDDEN, HIDDEN)
        whs.append(w)
        bhs.append(b)
    if NB_LAYER > 0:
        wh = jnp.stack(whs)                                         # (L,45,45)
        bh = jnp.stack(bhs)                                         # (L,45,1)
    else:
        wh = jnp.zeros((0, HIDDEN, HIDDEN), jnp.float32)
        bh = jnp.zeros((0, HIDDEN, 1), jnp.float32)
    gh = jnp.ones((NB_LAYER, HIDDEN, 1), jnp.float32)
    beh = jnp.zeros((NB_LAYER, HIDDEN, 1), jnp.float32)

    w1, b1 = linear(keys[1 + NB_LAYER], HIDDEN, NB_INPUT)           # (15,45), (15,1)
    g1 = jnp.ones((NB_INPUT, 1), jnp.float32)
    be1 = jnp.zeros((NB_INPUT, 1), jnp.float32)

    w2_row, b2 = linear(keys[2 + NB_LAYER], NB_INPUT, 1)            # (1,15), (1,1)
    w2 = w2_row.T                                                   # (15,1) column

    return (w0, b0, g0, be0, wh, bh, gh, beh, w1, b1, g1, be1, w2, b2)


@jax.jit
def mynet_forward(x, params):
    B = x.shape[0]
    # Feature-major orientation: batch on the lane axis inside the kernel.
    x_t = x.T                                                       # (15, B)
    vmem_spec = pl.BlockSpec(memory_space=pltpu.MemorySpace.VMEM)
    out_t = pl.pallas_call(
        mlp_kernel,
        out_shape=jax.ShapeDtypeStruct((1, B), jnp.float32),        # lane-dense output
        in_specs=[vmem_spec] * (1 + len(params)),
        out_specs=vmem_spec,
        compiler_params=pltpu.CompilerParams(
            # Whole batch + all weights VMEM-resident (exact whole-batch BN).
            # 32 MiB is safe on every generation (v5e default scoped VMEM is
            # only 16 MiB) and well under v7x's 64 MiB physical VMEM.
            vmem_limit_bytes=32 * 1024 * 1024,
        ),
    )(x_t, *params)
    return out_t.T                                                  # (B, 1)


def mynet_reference(x, params):
    """Independent pure-JAX reference in the natural (B, F) orientation."""
    (w0, b0, g0, be0, wh, bh, gh, beh, w1, b1, g1, be1, w2, b2) = params

    def bn(h, g, b):
        m = jnp.mean(h, axis=0, keepdims=True)
        v = jnp.mean((h - m) ** 2, axis=0, keepdims=True)           # two-pass, biased
        return (h - m) / jnp.sqrt(v + EPS) * g + b

    h = jnp.maximum(jnp.dot(x, w0.T, precision=HP) + b0[:, 0], 0.0)
    h = bn(h, g0[:, 0], be0[:, 0])
    for l in range(NB_LAYER):
        h = jnp.maximum(jnp.dot(h, wh[l].T, precision=HP) + bh[l, :, 0], 0.0)
        h = bn(h, gh[l, :, 0], beh[l, :, 0])
    h = jnp.maximum(jnp.dot(h, w1.T, precision=HP) + b1[:, 0], 0.0)
    h = bn(h, g1[:, 0], be1[:, 0])
    return jnp.dot(h, w2, precision=HP) + b2[0, 0]                  # (B, 1)


if __name__ == "__main__":
    key = jax.random.PRNGKey(0)
    kx, kp = jax.random.split(key)

    B = 256                                                         # small demo batch (2 lane-vregs)
    x = jax.random.normal(kx, (B, NB_INPUT), dtype=jnp.float32)
    params = init_params(kp)

    out = mynet_forward(x, params)
    out = jax.block_until_ready(out)

    ref = mynet_reference(x, params)
    assert out.shape == (B, 1)
    assert jnp.allclose(out, ref, atol=1e-3, rtol=1e-3), (
        "max abs diff", float(jnp.max(jnp.abs(out - ref))))

    print("KERNEL_OK")
</pallas_src>

<mosaic_0001>
module attributes {stable_mosaic.version = 11 : i64} {
  func.func @mlp_kernel(%arg0: memref<15x256xf32, #tpu.memory_space<vmem>>, %arg1: memref<45x15xf32, #tpu.memory_space<vmem>>, %arg2: memref<45x1xf32, #tpu.memory_space<vmem>>, %arg3: memref<45x1xf32, #tpu.memory_space<vmem>>, %arg4: memref<45x1xf32, #tpu.memory_space<vmem>>, %arg5: memref<2x45x45xf32, #tpu.memory_space<vmem>>, %arg6: memref<2x45x1xf32, #tpu.memory_space<vmem>>, %arg7: memref<2x45x1xf32, #tpu.memory_space<vmem>>, %arg8: memref<2x45x1xf32, #tpu.memory_space<vmem>>, %arg9: memref<15x45xf32, #tpu.memory_space<vmem>>, %arg10: memref<15x1xf32, #tpu.memory_space<vmem>>, %arg11: memref<15x1xf32, #tpu.memory_space<vmem>>, %arg12: memref<15x1xf32, #tpu.memory_space<vmem>>, %arg13: memref<15x1xf32, #tpu.memory_space<vmem>>, %arg14: memref<1x1xf32, #tpu.memory_space<vmem>>, %arg15: memref<1x256xf32, #tpu.memory_space<vmem>>) attributes {dimension_semantics = [], scalar_prefetch = 0 : i64, scratch_operands = 0 : i64, tpu.core_type = #tpu.core_type<tc>} {
    %c0 = arith.constant 0 : index
    %c0_0 = arith.constant 0 : index
    %0 = vector.load %arg0[%c0, %c0_0] : memref<15x256xf32, #tpu.memory_space<vmem>>, vector<15x256xf32>
    %c0_1 = arith.constant 0 : index
    %c0_2 = arith.constant 0 : index
    %1 = vector.load %arg1[%c0_1, %c0_2] : memref<45x15xf32, #tpu.memory_space<vmem>>, vector<45x15xf32>
    %cst = arith.constant dense<0.000000e+00> : vector<45x256xf32>
    %2 = tpu.matmul %1, %0, %cst {dimension_numbers = #tpu.dot_dimension_numbers<[1], [0], [0], [1], [0, 0, 1, 1], [], []>, precision = #tpu.contract_precision<fp32>} : vector<45x15xf32>, vector<15x256xf32>, vector<45x256xf32> -> vector<45x256xf32>
    %c0_3 = arith.constant 0 : index
    %c0_4 = arith.constant 0 : index
    %3 = vector.load %arg2[%c0_3, %c0_4] : memref<45x1xf32, #tpu.memory_space<vmem>>, vector<45x1xf32>
    %4 = vector.broadcast %3 : vector<45x1xf32> to vector<45x256xf32>
    %5 = arith.addf %2, %4 : vector<45x256xf32>
    %cst_5 = arith.constant 0.000000e+00 : f32
    %6 = vector.broadcast %cst_5 : f32 to vector<45x256xf32>
    %7 = arith.maximumf %5, %6 : vector<45x256xf32>
    %c0_6 = arith.constant 0 : index
    %c0_7 = arith.constant 0 : index
    %8 = vector.load %arg3[%c0_6, %c0_7] : memref<45x1xf32, #tpu.memory_space<vmem>>, vector<45x1xf32>
    %c0_8 = arith.constant 0 : index
    %c0_9 = arith.constant 0 : index
    %9 = vector.load %arg4[%c0_8, %c0_9] : memref<45x1xf32, #tpu.memory_space<vmem>>, vector<45x1xf32>
    %cst_10 = arith.constant dense<0.000000e+00> : vector<45xf32>
    %10 = vector.multi_reduction <add>, %7, %cst_10 [1] : vector<45x256xf32> to vector<45xf32>
    %11 = vector.shape_cast %10 : vector<45xf32> to vector<45x1xf32>
    %cst_11 = arith.constant 2.560000e+02 : f32
    %12 = vector.broadcast %cst_11 : f32 to vector<45x1xf32>
    %13 = arith.divf %11, %12 : vector<45x1xf32>
    %14 = arith.mulf %7, %7 : vector<45x256xf32>
    %cst_12 = arith.constant dense<0.000000e+00> : vector<45xf32>
    %15 = vector.multi_reduction <add>, %14, %cst_12 [1] : vector<45x256xf32> to vector<45xf32>
    %16 = vector.shape_cast %15 : vector<45xf32> to vector<45x1xf32>
    %cst_13 = arith.constant 2.560000e+02 : f32
    %17 = vector.broadcast %cst_13 : f32 to vector<45x1xf32>
    %18 = arith.divf %16, %17 : vector<45x1xf32>
    %19 = arith.mulf %13, %13 : vector<45x1xf32>
    %20 = arith.subf %18, %19 : vector<45x1xf32>
    %cst_14 = arith.constant 0.000000e+00 : f32
    %21 = vector.broadcast %cst_14 : f32 to vector<45x1xf32>
    %22 = arith.maximumf %20, %21 : vector<45x1xf32>
    %23 = vector.broadcast %13 : vector<45x1xf32> to vector<45x256xf32>
    %24 = arith.subf %7, %23 : vector<45x256xf32>
    %cst_15 = arith.constant 9.99999974E-6 : f32
    %25 = vector.broadcast %cst_15 : f32 to vector<45x1xf32>
    %26 = arith.addf %22, %25 : vector<45x1xf32>
    %27 = math.rsqrt %26 : vector<45x1xf32>
    %28 = vector.broadcast %27 : vector<45x1xf32> to vector<45x256xf32>
    %29 = arith.mulf %24, %28 : vector<45x256xf32>
    %30 = vector.broadcast %8 : vector<45x1xf32> to vector<45x256xf32>
    %31 = arith.mulf %29, %30 : vector<45x256xf32>
    %32 = vector.broadcast %9 : vector<45x1xf32> to vector<45x256xf32>
    %33 = arith.addf %31, %32 : vector<45x256xf32>
    %c0_16 = arith.constant 0 : index
    %c0_17 = arith.constant 0 : index
    %c0_18 = arith.constant 0 : index
    %34 = vector.load %arg5[%c0_16, %c0_17, %c0_18] : memref<2x45x45xf32, #tpu.memory_space<vmem>>, vector<1x45x45xf32>
    %35 = vector.shape_cast %34 : vector<1x45x45xf32> to vector<45x45xf32>
    %cst_19 = arith.constant dense<0.000000e+00> : vector<45x256xf32>
    %36 = tpu.matmul %35, %33, %cst_19 {dimension_numbers = #tpu.dot_dimension_numbers<[1], [0], [0], [1], [0, 0, 1, 1], [], []>, precision = #tpu.contract_precision<fp32>} : vector<45x45xf32>, vector<45x256xf32>, vector<45x256xf32> -> vector<45x256xf32>
    %c0_20 = arith.constant 0 : index
    %c0_21 = arith.constant 0 : index
    %c0_22 = arith.constant 0 : index
    %37 = vector.load %arg6[%c0_20, %c0_21, %c0_22] : memref<2x45x1xf32, #tpu.memory_space<vmem>>, vector<1x45x1xf32>
    %38 = vector.shape_cast %37 : vector<1x45x1xf32> to vector<45x1xf32>
    %39 = vector.broadcast %38 : vector<45x1xf32> to vector<45x256xf32>
    %40 = arith.addf %36, %39 : vector<45x256xf32>
    %cst_23 = arith.constant 0.000000e+00 : f32
    %41 = vector.broadcast %cst_23 : f32 to vector<45x256xf32>
    %42 = arith.maximumf %40, %41 : vector<45x256xf32>
    %c0_24 = arith.constant 0 : index
    %c0_25 = arith.constant 0 : index
    %c0_26 = arith.constant 0 : index
    %43 = vector.load %arg7[%c0_24, %c0_25, %c0_26] : memref<2x45x1xf32, #tpu.memory_space<vmem>>, vector<1x45x1xf32>
    %44 = vector.shape_cast %43 : vector<1x45x1xf32> to vector<45x1xf32>
    %c0_27 = arith.constant 0 : index
    %c0_28 = arith.constant 0 : index
    %c0_29 = arith.constant 0 : index
    %45 = vector.load %arg8[%c0_27, %c0_28, %c0_29] : memref<2x45x1xf32, #tpu.memory_space<vmem>>, vector<1x45x1xf32>
    %46 = vector.shape_cast %45 : vector<1x45x1xf32> to vector<45x1xf32>
    %cst_30 = arith.constant dense<0.000000e+00> : vector<45xf32>
    %47 = vector.multi_reduction <add>, %42, %cst_30 [1] : vector<45x256xf32> to vector<45xf32>
    %48 = vector.shape_cast %47 : vector<45xf32> to vector<45x1xf32>
    %cst_31 = arith.constant 2.560000e+02 : f32
    %49 = vector.broadcast %cst_31 : f32 to vector<45x1xf32>
    %50 = arith.divf %48, %49 : vector<45x1xf32>
    %51 = arith.mulf %42, %42 : vector<45x256xf32>
    %cst_32 = arith.constant dense<0.000000e+00> : vector<45xf32>
    %52 = vector.multi_reduction <add>, %51, %cst_32 [1] : vector<45x256xf32> to vector<45xf32>
    %53 = vector.shape_cast %52 : vector<45xf32> to vector<45x1xf32>
    %cst_33 = arith.constant 2.560000e+02 : f32
    %54 = vector.broadcast %cst_33 : f32 to vector<45x1xf32>
    %55 = arith.divf %53, %54 : vector<45x1xf32>
    %56 = arith.mulf %50, %50 : vector<45x1xf32>
    %57 = arith.subf %55, %56 : vector<45x1xf32>
    %cst_34 = arith.constant 0.000000e+00 : f32
    %58 = vector.broadcast %cst_34 : f32 to vector<45x1xf32>
    %59 = arith.maximumf %57, %58 : vector<45x1xf32>
    %60 = vector.broadcast %50 : vector<45x1xf32> to vector<45x256xf32>
    %61 = arith.subf %42, %60 : vector<45x256xf32>
    %cst_35 = arith.constant 9.99999974E-6 : f32
    %62 = vector.broadcast %cst_35 : f32 to vector<45x1xf32>
    %63 = arith.addf %59, %62 : vector<45x1xf32>
    %64 = math.rsqrt %63 : vector<45x1xf32>
    %65 = vector.broadcast %64 : vector<45x1xf32> to vector<45x256xf32>
    %66 = arith.mulf %61, %65 : vector<45x256xf32>
    %67 = vector.broadcast %44 : vector<45x1xf32> to vector<45x256xf32>
    %68 = arith.mulf %66, %67 : vector<45x256xf32>
    %69 = vector.broadcast %46 : vector<45x1xf32> to vector<45x256xf32>
    %70 = arith.addf %68, %69 : vector<45x256xf32>
    %c1 = arith.constant 1 : index
    %c0_36 = arith.constant 0 : index
    %c0_37 = arith.constant 0 : index
    %71 = vector.load %arg5[%c1, %c0_36, %c0_37] : memref<2x45x45xf32, #tpu.memory_space<vmem>>, vector<1x45x45xf32>
    %72 = vector.shape_cast %71 : vector<1x45x45xf32> to vector<45x45xf32>
    %cst_38 = arith.constant dense<0.000000e+00> : vector<45x256xf32>
    %73 = tpu.matmul %72, %70, %cst_38 {dimension_numbers = #tpu.dot_dimension_numbers<[1], [0], [0], [1], [0, 0, 1, 1], [], []>, precision = #tpu.contract_precision<fp32>} : vector<45x45xf32>, vector<45x256xf32>, vector<45x256xf32> -> vector<45x256xf32>
    %c1_39 = arith.constant 1 : index
    %c0_40 = arith.constant 0 : index
    %c0_41 = arith.constant 0 : index
    %74 = vector.load %arg6[%c1_39, %c0_40, %c0_41] : memref<2x45x1xf32, #tpu.memory_space<vmem>>, vector<1x45x1xf32>
    %75 = vector.shape_cast %74 : vector<1x45x1xf32> to vector<45x1xf32>
    %76 = vector.broadcast %75 : vector<45x1xf32> to vector<45x256xf32>
    %77 = arith.addf %73, %76 : vector<45x256xf32>
    %cst_42 = arith.constant 0.000000e+00 : f32
    %78 = vector.broadcast %cst_42 : f32 to vector<45x256xf32>
    %79 = arith.maximumf %77, %78 : vector<45x256xf32>
    %c1_43 = arith.constant 1 : index
    %c0_44 = arith.constant 0 : index
    %c0_45 = arith.constant 0 : index
    %80 = vector.load %arg7[%c1_43, %c0_44, %c0_45] : memref<2x45x1xf32, #tpu.memory_space<vmem>>, vector<1x45x1xf32>
    %81 = vector.shape_cast %80 : vector<1x45x1xf32> to vector<45x1xf32>
    %c1_46 = arith.constant 1 : index
    %c0_47 = arith.constant 0 : index
    %c0_48 = arith.constant 0 : index
    %82 = vector.load %arg8[%c1_46, %c0_47, %c0_48] : memref<2x45x1xf32, #tpu.memory_space<vmem>>, vector<1x45x1xf32>
    %83 = vector.shape_cast %82 : vector<1x45x1xf32> to vector<45x1xf32>
    %cst_49 = arith.constant dense<0.000000e+00> : vector<45xf32>
    %84 = vector.multi_reduction <add>, %79, %cst_49 [1] : vector<45x256xf32> to vector<45xf32>
    %85 = vector.shape_cast %84 : vector<45xf32> to vector<45x1xf32>
    %cst_50 = arith.constant 2.560000e+02 : f32
    %86 = vector.broadcast %cst_50 : f32 to vector<45x1xf32>
    %87 = arith.divf %85, %86 : vector<45x1xf32>
    %88 = arith.mulf %79, %79 : vector<45x256xf32>
    %cst_51 = arith.constant dense<0.000000e+00> : vector<45xf32>
    %89 = vector.multi_reduction <add>, %88, %cst_51 [1] : vector<45x256xf32> to vector<45xf32>
    %90 = vector.shape_cast %89 : vector<45xf32> to vector<45x1xf32>
    %cst_52 = arith.constant 2.560000e+02 : f32
    %91 = vector.broadcast %cst_52 : f32 to vector<45x1xf32>
    %92 = arith.divf %90, %91 : vector<45x1xf32>
    %93 = arith.mulf %87, %87 : vector<45x1xf32>
    %94 = arith.subf %92, %93 : vector<45x1xf32>
    %cst_53 = arith.constant 0.000000e+00 : f32
    %95 = vector.broadcast %cst_53 : f32 to vector<45x1xf32>
    %96 = arith.maximumf %94, %95 : vector<45x1xf32>
    %97 = vector.broadcast %87 : vector<45x1xf32> to vector<45x256xf32>
    %98 = arith.subf %79, %97 : vector<45x256xf32>
    %cst_54 = arith.constant 9.99999974E-6 : f32
    %99 = vector.broadcast %cst_54 : f32 to vector<45x1xf32>
    %100 = arith.addf %96, %99 : vector<45x1xf32>
    %101 = math.rsqrt %100 : vector<45x1xf32>
    %102 = vector.broadcast %101 : vector<45x1xf32> to vector<45x256xf32>
    %103 = arith.mulf %98, %102 : vector<45x256xf32>
    %104 = vector.broadcast %81 : vector<45x1xf32> to vector<45x256xf32>
    %105 = arith.mulf %103, %104 : vector<45x256xf32>
    %106 = vector.broadcast %83 : vector<45x1xf32> to vector<45x256xf32>
    %107 = arith.addf %105, %106 : vector<45x256xf32>
    %c0_55 = arith.constant 0 : index
    %c0_56 = arith.constant 0 : index
    %108 = vector.load %arg9[%c0_55, %c0_56] : memref<15x45xf32, #tpu.memory_space<vmem>>, vector<15x45xf32>
    %cst_57 = arith.constant dense<0.000000e+00> : vector<15x256xf32>
    %109 = tpu.matmul %108, %107, %cst_57 {dimension_numbers = #tpu.dot_dimension_numbers<[1], [0], [0], [1], [0, 0, 1, 1], [], []>, precision = #tpu.contract_precision<fp32>} : vector<15x45xf32>, vector<45x256xf32>, vector<15x256xf32> -> vector<15x256xf32>
    %c0_58 = arith.constant 0 : index
    %c0_59 = arith.constant 0 : index
    %110 = vector.load %arg10[%c0_58, %c0_59] : memref<15x1xf32, #tpu.memory_space<vmem>>, vector<15x1xf32>
    %111 = vector.broadcast %110 : vector<15x1xf32> to vector<15x256xf32>
    %112 = arith.addf %109, %111 : vector<15x256xf32>
    %cst_60 = arith.constant 0.000000e+00 : f32
    %113 = vector.broadcast %cst_60 : f32 to vector<15x256xf32>
    %114 = arith.maximumf %112, %113 : vector<15x256xf32>
    %c0_61 = arith.constant 0 : index
    %c0_62 = arith.constant 0 : index
    %115 = vector.load %arg11[%c0_61, %c0_62] : memref<15x1xf32, #tpu.memory_space<vmem>>, vector<15x1xf32>
    %c0_63 = arith.constant 0 : index
    %c0_64 = arith.constant 0 : index
    %116 = vector.load %arg12[%c0_63, %c0_64] : memref<15x1xf32, #tpu.memory_space<vmem>>, vector<15x1xf32>
    %cst_65 = arith.constant dense<0.000000e+00> : vector<15xf32>
    %117 = vector.multi_reduction <add>, %114, %cst_65 [1] : vector<15x256xf32> to vector<15xf32>
    %118 = vector.shape_cast %117 : vector<15xf32> to vector<15x1xf32>
    %cst_66 = arith.constant 2.560000e+02 : f32
    %119 = vector.broadcast %cst_66 : f32 to vector<15x1xf32>
    %120 = arith.divf %118, %119 : vector<15x1xf32>
    %121 = arith.mulf %114, %114 : vector<15x256xf32>
    %cst_67 = arith.constant dense<0.000000e+00> : vector<15xf32>
    %122 = vector.multi_reduction <add>, %121, %cst_67 [1] : vector<15x256xf32> to vector<15xf32>
    %123 = vector.shape_cast %122 : vector<15xf32> to vector<15x1xf32>
    %cst_68 = arith.constant 2.560000e+02 : f32
    %124 = vector.broadcast %cst_68 : f32 to vector<15x1xf32>
    %125 = arith.divf %123, %124 : vector<15x1xf32>
    %126 = arith.mulf %120, %120 : vector<15x1xf32>
    %127 = arith.subf %125, %126 : vector<15x1xf32>
    %cst_69 = arith.constant 0.000000e+00 : f32
    %128 = vector.broadcast %cst_69 : f32 to vector<15x1xf32>
    %129 = arith.maximumf %127, %128 : vector<15x1xf32>
    %130 = vector.broadcast %120 : vector<15x1xf32> to vector<15x256xf32>
    %131 = arith.subf %114, %130 : vector<15x256xf32>
    %cst_70 = arith.constant 9.99999974E-6 : f32
    %132 = vector.broadcast %cst_70 : f32 to vector<15x1xf32>
    %133 = arith.addf %129, %132 : vector<15x1xf32>
    %134 = math.rsqrt %133 : vector<15x1xf32>
    %135 = vector.broadcast %134 : vector<15x1xf32> to vector<15x256xf32>
    %136 = arith.mulf %131, %135 : vector<15x256xf32>
    %137 = vector.broadcast %115 : vector<15x1xf32> to vector<15x256xf32>
    %138 = arith.mulf %136, %137 : vector<15x256xf32>
    %139 = vector.broadcast %116 : vector<15x1xf32> to vector<15x256xf32>
    %140 = arith.addf %138, %139 : vector<15x256xf32>
    %c0_71 = arith.constant 0 : index
    %c0_72 = arith.constant 0 : index
    %141 = vector.load %arg13[%c0_71, %c0_72] : memref<15x1xf32, #tpu.memory_space<vmem>>, vector<15x1xf32>
    %142 = vector.broadcast %141 : vector<15x1xf32> to vector<15x256xf32>
    %143 = arith.mulf %140, %142 : vector<15x256xf32>
    %cst_73 = arith.constant dense<0.000000e+00> : vector<256xf32>
    %144 = vector.multi_reduction <add>, %143, %cst_73 [0] : vector<15x256xf32> to vector<256xf32>
    %145 = vector.shape_cast %144 : vector<256xf32> to vector<1x256xf32>
    %c0_74 = arith.constant 0 : index
    %c0_75 = arith.constant 0 : index
    %146 = vector.load %arg14[%c0_74, %c0_75] : memref<1x1xf32, #tpu.memory_space<vmem>>, vector<1x1xf32>
    %147 = vector.broadcast %146 : vector<1x1xf32> to vector<1x256xf32>
    %148 = arith.addf %145, %147 : vector<1x256xf32>
    %c0_76 = arith.constant 0 : index
    %c0_77 = arith.constant 0 : index
    %149 = vector.load %arg15[%c0_76, %c0_77] : memref<1x256xf32, #tpu.memory_space<vmem>>, vector<1x256xf32>
    tpu.vector_store %arg15[%c0_76, %c0_77], %148 {strides = array<i32>} : memref<1x256xf32, #tpu.memory_space<vmem>>, vector<1x256xf32>,
    return
  }
}

</mosaic_0001>

<bundles_post_ra>
// kernel: mynet_forward.1
= control target key start
LH: loop header
LB: loop body
LE: loop exit
PB: predicated region body
PF: predicated region fallthrough
CT: control target
= control target key end

     0   :  { %s6457_s0 = inlined_call_operand.vmem [shape: f32[15,256], index: 0, kind: input, shape index: {}]   ;;  %s6458_s1 = inlined_call_operand.vmem [shape: f32[45,15], index: 1, kind: input, shape index: {}]   ;;  %s6459_s2 = inlined_call_operand.vmem [shape: f32[45,1], index: 2, kind: input, shape index: {}]   ;;  %s6460_s3 = inlined_call_operand.vmem [shape: f32[45,1], index: 3, kind: input, shape index: {}]   ;;  %s6461_s4 = inlined_call_operand.vmem [shape: f32[45,1], index: 4, kind: input, shape index: {}]   ;;  %s6462_s5 = inlined_call_operand.vmem [shape: f32[2,45,45], index: 5, kind: input, shape index: {}]   ;;  %s6463_s6 = inlined_call_operand.vmem [shape: f32[2,45,1], index: 6, kind: input, shape index: {}]   ;;  %s6464_s7 = inlined_call_operand.vmem [shape: f32[2,45,1], index: 7, kind: input, shape index: {}]   ;;  %s6465_s8 = inlined_call_operand.vmem [shape: f32[2,45,1], index: 8, kind: input, shape index: {}]   ;;  %s6466_s9 = inlined_call_operand.vmem [shape: f32[15,45], index: 9, kind: input, shape index: {}]   ;;  %s6467_s10 = inlined_call_operand.vmem [shape: f32[15,1], index: 10, kind: input, shape index: {}]   ;;  %s6468_s11 = inlined_call_operand.vmem [shape: f32[15,1], index: 11, kind: input, shape index: {}]   ;;  %s6469_s12 = inlined_call_operand.vmem [shape: f32[15,1], index: 12, kind: input, shape index: {}]   ;;  %s6470_s13 = inlined_call_operand.vmem [shape: f32[15,1], index: 13, kind: input, shape index: {}]   ;;  %s6471_s14 = inlined_call_operand.<no memory space> [shape: f32[1,1], index: 14, kind: input, shape index: {}]   ;;  %s6472_s15 = inlined_call_operand.hbm [shape: f32[1,256], index: 15, kind: output, shape index: {}]  }
   0x1   :  { %v20_v0 = vstv %s6471_s14 }
   0x2   :  { %21 = vst [vmem:[#allocation2] sm:$0x1] %v20_v0 }
   0x3   :  { %v54_v1 = vld [vmem:[%s6457_s0 + $0x8] sm:$0xff]  ;;  %v56_v2 = vld [vmem:[%s6457_s0 + $0x18] sm:$0x7f]  ;;  %vm118_vm0 = vcmask 1046528   ;;  %v53_v3 = vld [vmem:[%s6457_s0] sm:$0xff]  ;;  %v4763_v8 = vmov 0.0  }
   0x4   :  { %v123_v4 = vsel %vm118_vm0, %v56_v2, 0  ;;  %v125_v5 = vand.u32 4294901760, %v54_v1  ;;  %v55_v6 = vld [vmem:[%s6457_s0 + $0x10] sm:$0x7f]  ;;  %v127_v7 = vand.u32 4294901760, %v53_v3  ;;  %344 = vmatprep.mubr.f32.mxu0 %v4763_v8  ;;  %v57_v9 = vld [vmem:[%s6458_s1] sm:$0xff]  ;;  %193 = vmatprep.mubr.f32.mxu1 %v4763_v8 }
   0x5   :  { %v129_v10 = vand.u32 4294901760, %v123_v4  ;;  %v120_v11 = vsel %vm118_vm0, %v55_v6, 0  ;;  %vm99_vm1 = vcmask 121856   ;;  %v58_v12 = vld [vmem:[%s6458_s1 + $0x8] sm:$0xff]  ;;  %v59_v22 = vld [vmem:[%s6458_s1 + $0x10] sm:$0xff]  ;;  %v60_v32 = vld [vmem:[%s6458_s1 + $0x18] sm:$0xff] }
   0x6   :  { %v4872_v13 = vsub.f32 %v54_v1, %v125_v5  ;;  %v131_v14 = vand.u32 4294901760, %v120_v11  ;;  %v4874_v15 = vsub.f32 %v53_v3, %v127_v7  ;;  %v101_v17 = vsel %vm99_vm1, %v57_v9, 0 }
   0x7   :  { %v4876_v16 = vsub.f32 %v123_v4, %v129_v10  ;;  %v104_v21 = vsel %vm99_vm1, %v58_v12, 0  ;;  %v4895_v27 = vand.u32 4294901760, %v101_v17  ;;  %v107_v30 = vsel %vm99_vm1, %v59_v22, 0 }
   0x8   :  { %v262_v18 = vand.u32 4294901760, %v4872_v13  ;;  %v268_v19 = vand.u32 4294901760, %v4874_v15  ;;  %v4881_v20 = vsub.f32 %v120_v11, %v131_v14  ;;  %v4900_v29 = vand.u32 4294901760, %v104_v21 }
   0x9   :  { %v274_v23 = vand.u32 4294901760, %v4876_v16  ;;  %v4903_v31 = vpack.c.bf16 %v129_v10, %v125_v5  ;;  %v4911_v36 = vpack.c.bf16 %v131_v14, %v127_v7 }
   0xa   :  { %v263_v24 = vsub.f32 %v4872_v13, %v262_v18  ;;  %v269_v25 = vsub.f32 %v4874_v15, %v268_v19  ;;  %v280_v26 = vand.u32 4294901760, %v4881_v20 }
   0xb   :  { %v275_v28 = vsub.f32 %v4876_v16, %v274_v23 }
   0xc   :  { %v264_v33 = vand.u32 4294901760, %v263_v24  ;;  %v270_v34 = vand.u32 4294901760, %v269_v25  ;;  %v281_v35 = vsub.f32 %v4881_v20, %v280_v26 }
   0xd   :  { %22 = vsyncpa [#allocation4], 0  ;;  %v276_v37 = vand.u32 4294901760, %v275_v28  ;;  %v4914_v38 = vsub.f32 %v101_v17, %v4895_v27  ;;  %v4917_v39 = vsub.f32 %v104_v21, %v4900_v29  ;;  %4212 = vmatprep.subr.bf16.mxu1 %v4903_v31  ;;  %v4219_v41 = vpack.c.bf16 %v4876_v16, %v4872_v13  ;;  %v61_v45 = vld [vmem:[%s6458_s1 + $0x20] sm:$0xff]  ;;  %v65_v53 = vld [vmem:[%s6459_s2 + $0x10] sm:$0xff] }
   0xe   :  { %v282_v40 = vand.u32 4294901760, %v281_v35  ;;  %v110_v42 = vsel %vm99_vm1, %v60_v32, 0  ;;  %4214 = vmatpush1.bf16.msra.mxu1 %v4911_v36  ;;  %v4924_v44 = vand.u32 4294901760, %v107_v30  ;;  %v4221_v54 = vpack.c.bf16 %v4881_v20, %v4874_v15  ;;  %v62_v56 = vld [vmem:[%s6458_s1 + $0x28] sm:$0x1f]  ;;  %v63_v0 = vld [vmem:[%s6459_s2] sm:$0xff] }
   0xf   :  { %v4215_v43 = vpack.c.bf16 %v276_v37, %v264_v33  ;;  %v196_v46 = vand.u32 4294901760, %v4914_v38  ;;  %v207_v47 = vand.u32 4294901760, %v4917_v39  ;;  %v4934_v50 = vand.u32 4294901760, %v110_v42  ;;  %v66_v3 = vld [vmem:[%s6459_s2 + $0x18] sm:$0xff]  ;;  %v64_v9 = vld [vmem:[%s6459_s2 + $0x8] sm:$0xff]  ;;  %v67_v11 = vld [vmem:[%s6459_s2 + $0x20] sm:$0xff] }
  0x10   :  { %v4217_v48 = vpack.c.bf16 %v282_v40, %v270_v34  ;;  %v4932_v49 = vsub.f32 %v107_v30, %v4924_v44  ;;  %v113_v55 = vsel %vm99_vm1, %v61_v45, 0  ;;  %v4764_v59 = vmov 0   ;;  %v68_v21 = vld [vmem:[%s6459_s2 + $0x28] sm:$0x1f]  ;;  %v873_v30 = vld [vmem:[%s6460_s3] sm:$0xff]  ;;  %v881_v33 = vld [vmem:[%s6461_s4 + $0x10] sm:$0xff] }
  0x11   :  { %4216 = vmatprep.subr.bf16.mxu0 %v4215_v43  ;;  %v197_v51 = vsub.f32 %v4914_v38, %v196_v46  ;;  %v208_v52 = vsub.f32 %v4917_v39, %v207_v47  ;;  %4451 = vmatprep.subr.bf16.mxu1 %v4215_v43  ;;  %v4954_v60 = vsub.f32 %v110_v42, %v4934_v50  ;;  %v4956_v61 = vand.u32 4294901760, %v113_v55  ;;  %v874_v13 = vld [vmem:[%s6460_s3 + $0x8] sm:$0xff]  ;;  %v876_v34 = vld [vmem:[%s6460_s3 + $0x18] sm:$0xff]  ;;  %v877_v40 = vld [vmem:[%s6460_s3 + $0x20] sm:$0xff] }
  0x12   :  { %4218 = vmatpush1.bf16.msra.mxu0 %v4217_v48  ;;  %v218_v57 = vand.u32 4294901760, %v4932_v49  ;;  %4698 = vset.pattern.permute.xlu1 %v4764_v59  ;;  %v116_v1 = vsel %vm99_vm1, %v62_v56, 0  ;;  %v4227_v22 = vpack.c.bf16 %v274_v23, %v262_v18  ;;  %v879_v18 = vld [vmem:[%s6461_s4] sm:$0xff]  ;;  %v875_v23 = vld [vmem:[%s6460_s3 + $0x10] sm:$0xff]  ;;  %v880_v32 = vld [vmem:[%s6461_s4 + $0x8] sm:$0xff]  ;;  %vm900_vm2 = vcmask 1044480  }
  0x13   :  { %4220 = vmatprep.subr.bf16.mxu0 %v4219_v41  ;;  %v198_v58 = vand.u32 4294901760, %v197_v51  ;;  %4697 = vset.pattern.permute.xlu0 %v4764_v59  ;;  %v209_v62 = vand.u32 4294901760, %v208_v52  ;;  %v229_v2 = vand.u32 4294901760, %v4954_v60  ;;  %v4974_v4 = vsub.f32 %v113_v55, %v4956_v61  ;;  %v878_v35 = vld [vmem:[%s6460_s3 + $0x28] sm:$0x1f]  ;;  %v882_v37 = vld [vmem:[%s6461_s4 + $0x18] sm:$0xff] }
  0x14   :  { %81 = vperm.xlu1 %4698, %v65_v53   ;;  %v219_v63 = vsub.f32 %v4932_v49, %v218_v57  ;;  %71 = vperm.xlu0 %4697, %v63_v0   ;;  %v4976_v5 = vand.u32 4294901760, %v116_v1  ;;  %v4229_v41 = vpack.c.bf16 %v280_v26, %v268_v19  ;;  %vm1131_vm3 = vcmask 367616  }
  0x15   :  { %346 = vmatmul.mubr.f32.vlgmr.msra.gmra.mrb[0].mxu0 %v4895_v27  ;;  %199 = vmatmul.mubr.f32.vlgmr.msra.gmra.mrb[0].mxu1 %v198_v58  ;;  %v230_v7 = vsub.f32 %v4954_v60, %v229_v2  ;;  %v240_v10 = vand.u32 4294901760, %v4974_v4 }
  0x16   :  { %351 = vmatprep.mubr.f32.mxu0 %v4763_v8  ;;  %4222 = vmatpush1.bf16.msra.mxu0 %v4221_v54  ;;  %v220_v6 = vand.u32 4294901760, %v219_v63  ;;  %v4992_v12 = vsub.f32 %v116_v1, %v4976_v5 }
  0x17   :  { %4224 = vmatprep.subr.bf16.mxu0 %v4903_v31  ;;  %204 = vmatprep.mubr.f32.mxu1 %v4763_v8  ;;  %v231_v14 = vand.u32 4294901760, %v230_v7  ;;  %v241_v17 = vsub.f32 %v4974_v4, %v240_v10 }
  0x18   :  { %4452 = vmatpush1.bf16.msra.mxu1 %v4217_v48  ;;  %86 = vperm.xlu1 %4698, %v66_v3   ;;  %v251_v24 = vand.u32 4294901760, %v4992_v12 }
  0x19   :  { %353 = vmatmul.mubr.f32.gmra.mrb[2].mxu0 %v4900_v29  ;;  %210 = vmatmul.mubr.f32.gmra.mrb[2].mxu1 %v209_v62  ;;  %v242_v25 = vand.u32 4294901760, %v241_v17 }
  0x1a   :  { %358 = vmatprep.mubr.f32.mxu0 %v4763_v8  ;;  %215 = vmatprep.mubr.f32.mxu1 %v4763_v8  ;;  %v252_v28 = vsub.f32 %v4992_v12, %v251_v24 }
  0x1b   :  { %76 = vperm.xlu0 %4697, %v64_v9  }
  0x1c   :  { %91 = vperm.xlu1 %4698, %v67_v11   ;;  %v253_v16 = vand.u32 4294901760, %v252_v28 }
  0x1d   :  { %360 = vmatmul.mubr.f32.gmra.mrb[4].mxu0 %v4924_v44  ;;  %221 = vmatmul.mubr.f32.gmra.mrb[4].mxu1 %v220_v6 }
  0x1e   :  { %459 = vmatprep.mubr.f32.mxu0 %v4763_v8  ;;  %226 = vmatprep.mubr.f32.mxu1 %v4763_v8 }
  0x1f   :  { %96 = vperm.xlu0 %4697, %v68_v21  }
  0x20   :  { %1007 = vperm.xlu1 %4698, %v873_v30  }
  0x21   :  { %462 = vmatmul.mubr.f32.vlgmr.msra.gmra.mrb[0].mxu0 %v4914_v38  ;;  %232 = vmatmul.mubr.f32.gmra.mrb[6].mxu1 %v231_v14 }
  0x22   :  { %467 = vmatprep.mubr.f32.mxu0 %v4763_v8  ;;  %4226 = vmatpush1.bf16.msra.mxu0 %v4911_v36 }
  0x23   :  { %4228 = vmatprep.subr.bf16.mxu0 %v4227_v22  ;;  %237 = vmatprep.mubr.f32.mxu1 %v4763_v8 }
  0x24   :  { %1012 = vperm.xlu0 %4697, %v874_v13   ;;  %1049 = vperm.xlu1 %4698, %v879_v18  }
  0x25   :  { %470 = vmatmul.mubr.f32.gmra.mrb[2].mxu0 %v4917_v39  ;;  %243 = vmatmul.mubr.f32.gmra.mrb[8].mxu1 %v242_v25 }
  0x26   :  { %475 = vmatprep.mubr.f32.mxu0 %v4763_v8  ;;  %248 = vmatprep.mubr.f32.mxu1 %v4763_v8 }
  0x28   :  { %1017 = vperm.xlu0 %4697, %v875_v23   ;;  %1054 = vperm.xlu1 %4698, %v880_v32  }
  0x29   :  { %478 = vmatmul.mubr.f32.gmra.mrb[4].mxu0 %v4932_v49  ;;  %254 = vmatmul.mubr.f32.gmra.mrb[10].mxu1 %v253_v16 }
  0x2a   :  { %483 = vmatprep.mubr.f32.mxu0 %v4763_v8  ;;  %365 = vmatprep.mubr.f32.mxu1 %v4763_v8 }
  0x2c   :  { %1059 = vperm.xlu0 %4697, %v881_v33   ;;  %1022 = vperm.xlu1 %4698, %v876_v34  }
  0x2d   :  { %486 = vmatmul.mubr.f32.gmra.mrb[6].mxu0 %v4954_v60  ;;  %367 = vmatmul.mubr.f32.vlgmr.msra.gmra.mrb[6].mxu1 %v4934_v50 }
  0x2e   :  { %491 = vmatprep.mubr.f32.mxu0 %v4763_v8  ;;  %372 = vmatprep.mubr.f32.mxu1 %v4763_v8 }
  0x30   :  { %1032 = vperm.xlu0 %4697, %v878_v35   ;;  %1064 = vperm.xlu1 %4698, %v882_v37  }
  0x31   :  { %494 = vmatmul.mubr.f32.gmra.mrb[8].mxu0 %v4974_v4  ;;  %374 = vmatmul.mubr.f32.gmra.mrb[8].mxu1 %v4956_v61 }
  0x32   :  { %499 = vmatprep.mubr.f32.mxu0 %v4763_v8  ;;  %379 = vmatprep.mubr.f32.mxu1 %v4763_v8 }
  0x34   :  { %1027 = vperm.xlu1 %4698, %v877_v40  }
  0x35   :  { %502 = vmatmul.mubr.f32.gmra.mrb[10].mxu0 %v4992_v12  ;;  %381 = vmatmul.mubr.f32.gmra.mrb[10].mxu1 %v4976_v5 }
  0x36   :  { %576 = vmatprep.mubr.f32.mxu0 %v4763_v8  ;;  %1232 = vmatprep.mubr.f32.mxu1 %v4763_v8 }
  0x39   :  { %580 = vmatmul.mubr.f32.vlgmr.msra.gmra.mrb[0].mxu0 %v196_v46 }
  0x3a   :  { %585 = vmatprep.mubr.f32.mxu0 %v4763_v8  ;;  %4230 = vmatpush1.bf16.msra.mxu0 %v4229_v41 }
  0x3b   :  { %4232 = vmatprep.subr.bf16.mxu0 %v4903_v31 }
  0x3d   :  { %589 = vmatmul.mubr.f32.gmra.mrb[2].mxu0 %v207_v47 }
  0x3e   :  { %594 = vmatprep.mubr.f32.mxu0 %v4763_v8 }
  0x41   :  { %598 = vmatmul.mubr.f32.gmra.mrb[4].mxu0 %v218_v57 }
  0x42   :  { %603 = vmatprep.mubr.f32.mxu0 %v4763_v8 }
  0x45   :  { %607 = vmatmul.mubr.f32.gmra.mrb[6].mxu0 %v229_v2 }
  0x46   :  { %612 = vmatprep.mubr.f32.mxu0 %v4763_v8 }
  0x49   :  { %616 = vmatmul.mubr.f32.gmra.mrb[8].mxu0 %v240_v10 }
  0x4a   :  { %621 = vmatprep.mubr.f32.mxu0 %v4763_v8 }
  0x4d   :  { %625 = vmatmul.mubr.f32.gmra.mrb[10].mxu0 %v251_v24 }
  0x4e   :  { %707 = vmatprep.mubr.f32.mxu0 %v4763_v8 }
  0x51   :  { %709 = vmatmul.mubr.f32.vlgmr.msra.gmra.mrb[0].mxu0 %v4895_v27 }
  0x52   :  { %714 = vmatprep.mubr.f32.mxu0 %v4763_v8  ;;  %4234 = vmatpush1.bf16.msra.mxu0 %v4911_v36 }
  0x55   :  { %716 = vmatmul.mubr.f32.gmra.mrb[2].mxu0 %v4900_v29 }
  0x56   :  { %721 = vmatprep.mubr.f32.mxu0 %v4763_v8 }
  0x59   :  { %723 = vmatmul.mubr.f32.gmra.mrb[4].mxu0 %v4924_v44 }
  0x5a   :  { %728 = vmatprep.mubr.f32.mxu0 %v4763_v8 }
  0x5d   :  { %730 = vmatmul.mubr.f32.gmra.mrb[6].mxu0 %v4934_v50 }
  0x5e   :  { %735 = vmatprep.mubr.f32.mxu0 %v4763_v8 }
  0x61   :  { %737 = vmatmul.mubr.f32.gmra.mrb[8].mxu0 %v4956_v61 }
  0x62   :  { %742 = vmatprep.mubr.f32.mxu0 %v4763_v8 }
  0x65   :  { %744 = vmatmul.mubr.f32.gmra.mrb[10].mxu0 %v4976_v5 }
  0x66   :  { %818 = vmatprep.mubr.f32.mxu0 %v4763_v8 }
  0x69   :  { %820 = vmatmul.mubr.f32.vlgmr.msra.gmra.mrb[0].mxu0 %v4895_v27 }
  0x6a   :  { %825 = vmatprep.mubr.f32.mxu0 %v4763_v8 }
  0x6d   :  { %827 = vmatmul.mubr.f32.gmra.mrb[2].mxu0 %v4900_v29 }
  0x6e   :  { %832 = vmatprep.mubr.f32.mxu0 %v4763_v8 }
  0x71   :  { %834 = vmatmul.mubr.f32.gmra.mrb[4].mxu0 %v4924_v44 }
  0x72   :  { %839 = vmatprep.mubr.f32.mxu0 %v4763_v8 }
  0x75   :  { %841 = vmatmul.mubr.f32.gmra.mrb[6].mxu0 %v4934_v50 }
  0x76   :  { %846 = vmatprep.mubr.f32.mxu0 %v4763_v8 }
  0x79   :  { %848 = vmatmul.mubr.f32.gmra.mrb[8].mxu0 %v4956_v61 }
  0x7a   :  { %853 = vmatprep.mubr.f32.mxu0 %v4763_v8 }
  0x7d   :  { %855 = vmatmul.mubr.f32.gmra.mrb[10].mxu0 %v4976_v5 }
  0x7e   :  { %2366 = vmatprep.mubr.f32.mxu0 %v4763_v8 }
  0x93   :  { %v72_v44 = vpop.permute.xlu0 %71  ;;  %v82_v50 = vpop.permute.xlu1 %81 }
  0x97   :  { %v87_v2 = vpop.permute.xlu1 %86 }
  0x9a   :  { %v77_v51 = vpop.permute.xlu0 %76 }
  0x9b   :  { %v92_v16 = vpop.permute.xlu1 %91 }
  0xe8   :  { %v200_v15 = vpop.f32.mrb[0].mxu1 }
  0xe9   :  { %v202_v19 = vpop.f32.mrb[1].mxu1  ;;  %v201_v45 = vadd.f32 %v200_v15, %v72_v44 }
  0xea   :  { %v203_v46 = vadd.f32 %v202_v19, %v72_v44 }
  0xec   :  { %v211_v20 = vpop.f32.mrb[2].mxu1 }
  0xed   :  { %v213_v26 = vpop.f32.mrb[3].mxu1  ;;  %v212_v53 = vadd.f32 %v211_v20, %v77_v51 }
  0xee   :  { %v214_v55 = vadd.f32 %v213_v26, %v77_v51  ;;  %v97_v26 = vpop.permute.xlu0 %96 }
  0xf0   :  { %v222_v27 = vpop.f32.mrb[4].mxu1 }
  0xf1   :  { %v224_v29 = vpop.f32.mrb[5].mxu1  ;;  %v223_v0 = vadd.f32 %v222_v27, %v82_v50 }
  0xf2   :  { %v225_v3 = vadd.f32 %v224_v29, %v82_v50 }
 0x100   :  { %v368_v31 = vpop.f32.mrb[6].mxu1 }
 0x101   :  { %v370_v36 = vpop.f32.mrb[7].mxu1  ;;  %v4465_v17 = vadd.f32 %v368_v31, %v87_v2 }
 0x102   :  { %v4467_v22 = vadd.f32 %v370_v36, %v87_v2  ;;  %v883_v2 = vld [vmem:[%s6461_s4 + $0x20] sm:$0xff] }
 0x104   :  { %v375_v38 = vpop.f32.mrb[8].mxu1 }
 0x105   :  { %v377_v39 = vpop.f32.mrb[9].mxu1  ;;  %v4469_v34 = vadd.f32 %v375_v38, %v92_v16 }
 0x106   :  { %v4471_v37 = vadd.f32 %v377_v39, %v92_v16  ;;  %v2013_v16 = vld [vmem:[%s6464_s7 + $0x28] sm:$0x1f] }
 0x108   :  { %v5110_v42 = vpop.f32.mrb[10].mxu1 }
 0x109   :  { %v5112_v43 = vpop.f32.mrb[11].mxu1  ;;  %v4473_v38 = vadd.f32 %v5110_v42, %v97_v26 }
 0x10a   :  { %v4475_v39 = vadd.f32 %v5112_v43, %v97_v26 }
 0x13c   :  { %v821_v47 = vpop.f32.mrb[0].mxu0 }
 0x13d   :  { %v4454_v48 = vadd.f32 %v821_v47, %v201_v45  ;;  %v823_v49 = vpop.f32.mrb[1].mxu0 }
 0x13e   :  { %v4456_v52 = vadd.f32 %v823_v49, %v203_v46 }
 0x13f   :  { %v5114_v54 = vmax.f32 %v4454_v48, 0.0 }
 0x140   :  { %v5116_v56 = vmax.f32 %v4456_v52, 0.0  ;;  %v828_v57 = vpop.f32.mrb[2].mxu0 }
 0x141   :  { %v4458_v58 = vadd.f32 %v828_v57, %v212_v53  ;;  %v830_v59 = vpop.f32.mrb[3].mxu0  ;;  %v913_v60 = vmul.f32 %v5114_v54, %v5114_v54 }
 0x142   :  { %v4460_v61 = vadd.f32 %v830_v59, %v214_v55  ;;  %v885_v62 = vadd.f32 %v5116_v56, %v5114_v54  ;;  %v914_v63 = vmul.f32 %v5116_v56, %v5116_v56 }
 0x143   :  { %v5124_v1 = vmax.f32 %v4458_v58, 0.0 }
 0x144   :  { %v5126_v4 = vmax.f32 %v4460_v61, 0.0  ;;  %v835_v5 = vpop.f32.mrb[4].mxu0  ;;  %886 = vadd.xlane.f32.xlu0 %v885_v62  ;;  %v925_v9 = vadd.f32 %v914_v63, %v913_v60 }
 0x145   :  { %v4462_v6 = vadd.f32 %v835_v5, %v223_v0  ;;  %v837_v7 = vpop.f32.mrb[5].mxu0  ;;  %v915_v12 = vmul.f32 %v5124_v1, %v5124_v1  ;;  %v884_v5 = vld [vmem:[%s6461_s4 + $0x28] sm:$0x1f] }
 0x146   :  { %v4464_v10 = vadd.f32 %v837_v7, %v225_v3  ;;  %v888_v11 = vadd.f32 %v5126_v4, %v5124_v1  ;;  %v916_v14 = vmul.f32 %v5126_v4, %v5126_v4  ;;  %v1096_v3 = vld [vmem:[%s6463_s6 + $0x8] sm:$0xff]  ;;  %v1095_v7 = vld [vmem:[%s6463_s6] sm:$0xff] }
 0x147   :  { %v5134_v21 = vmax.f32 %v4462_v6, 0.0  ;;  %v1098_v6 = vld [vmem:[%s6463_s6 + $0x18] sm:$0xff] }
 0x148   :  { %v5136_v24 = vmax.f32 %v4464_v10, 0.0  ;;  %v842_v25 = vpop.f32.mrb[6].mxu0  ;;  %889 = vadd.xlane.f32.xlu1 %v888_v11  ;;  %926 = vadd.xlane.f32.xlu0 %v925_v9  ;;  %v928_v32 = vadd.f32 %v916_v14, %v915_v12  ;;  %v1099_v9 = vld [vmem:[%s6463_s6 + $0x20] sm:$0xff]  ;;  %v1097_v10 = vld [vmem:[%s6463_s6 + $0x10] sm:$0xff]  ;;  %v1100_v12 = vld [vmem:[%s6463_s6 + $0x28] sm:$0x1f] }
 0x149   :  { %v4466_v28 = vadd.f32 %v4465_v17, %v842_v25  ;;  %v844_v30 = vpop.f32.mrb[7].mxu0  ;;  %v917_v13 = vmul.f32 %v5134_v21, %v5134_v21  ;;  %v2008_v11 = vld [vmem:[%s6464_s7] sm:$0xff]  ;;  %v2009_v17 = vld [vmem:[%s6464_s7 + $0x8] sm:$0xff]  ;;  %v2010_v25 = vld [vmem:[%s6464_s7 + $0x10] sm:$0xff] }
 0x14a   :  { %v4468_v18 = vadd.f32 %v4467_v22, %v844_v30  ;;  %v891_v23 = vadd.f32 %v5136_v24, %v5134_v21  ;;  %v918_v33 = vmul.f32 %v5136_v24, %v5136_v24  ;;  %v2014_v14 = vld [vmem:[%s6465_s8] sm:$0xff]  ;;  %v2015_v22 = vld [vmem:[%s6465_s8 + $0x8] sm:$0xff]  ;;  %v2016_v30 = vld [vmem:[%s6465_s8 + $0x10] sm:$0xff] }
 0x14b   :  { %v5144_v35 = vmax.f32 %v4466_v28, 0.0  ;;  %v2011_v28 = vld [vmem:[%s6464_s7 + $0x18] sm:$0xff] }
 0x14c   :  { %v5146_v40 = vmax.f32 %v4468_v18, 0.0  ;;  %v849_v41 = vpop.f32.mrb[8].mxu0  ;;  %892 = vadd.xlane.f32.xlu1 %v891_v23  ;;  %929 = vadd.xlane.f32.xlu0 %v928_v32  ;;  %v931_v20 = vadd.f32 %v918_v33, %v917_v13  ;;  %v2017_v13 = vld [vmem:[%s6465_s8 + $0x18] sm:$0xff]  ;;  %v2012_v18 = vld [vmem:[%s6464_s7 + $0x20] sm:$0xff]  ;;  %v5234_v23 = vpop.permute.xlu1 %1007 }
 0x14d   :  { %v4470_v15 = vadd.f32 %v4469_v34, %v849_v41  ;;  %v851_v19 = vpop.f32.mrb[9].mxu0  ;;  %v919_v31 = vmul.f32 %v5144_v35, %v5144_v35  ;;  %v5238_v33 = vpop.permute.xlu0 %1012 }
 0x14e   :  { %v4472_v27 = vadd.f32 %v4471_v37, %v851_v19  ;;  %v894_v29 = vadd.f32 %v5146_v40, %v5144_v35  ;;  %v920_v36 = vmul.f32 %v5146_v40, %v5146_v40 }
 0x14f   :  { %v5156_v45 = vmax.f32 %v4470_v15, 0.0 }
 0x150   :  { %v856_v44 = vpop.f32.mrb[10].mxu0  ;;  %932 = vadd.xlane.f32.xlu1 %v931_v20  ;;  %895 = vadd.xlane.f32.xlu0 %v894_v29  ;;  %v5158_v48 = vmax.f32 %v4472_v27, 0.0  ;;  %v934_v50 = vadd.f32 %v920_v36, %v919_v31  ;;  %v5236_v32 = vpop.permute.xlu1 %1049 }
 0x151   :  { %v4474_v46 = vadd.f32 %v4473_v38, %v856_v44  ;;  %v858_v47 = vpop.f32.mrb[11].mxu0  ;;  %v921_v43 = vmul.f32 %v5156_v45, %v5156_v45  ;;  %v5242_v37 = vpop.permute.xlu0 %1017 }
 0x152   :  { %v4476_v49 = vadd.f32 %v4475_v39, %v858_v47  ;;  %v897_v55 = vadd.f32 %v5158_v48, %v5156_v45  ;;  %v922_v58 = vmul.f32 %v5158_v48, %v5158_v48 }
 0x153   :  { %v5160_v51 = vmax.f32 %v4474_v46, 0.0 }
 0x154   :  { %v5162_v52 = vmax.f32 %v4476_v49, 0.0  ;;  %935 = vadd.xlane.f32.xlu0 %v934_v50  ;;  %v937_v63 = vadd.f32 %v922_v58, %v921_v43  ;;  %v5240_v34 = vpop.permute.xlu1 %1054 }
 0x155   :  { %v901_v42 = vsel %vm900_vm2, %v5160_v51, 0.0  ;;  %v923_v53 = vmul.f32 %v5160_v51, %v5160_v51  ;;  %v5246_v15 = vpop.permute.xlu0 %1059 }
 0x156   :  { %v902_v57 = vsel %vm900_vm2, %v5162_v52, 0.0  ;;  %v924_v59 = vmul.f32 %v5162_v52, %v5162_v52 }
 0x157   :  { %v903_v60 = vadd.f32 %v902_v57, %v901_v42  ;;  %v940_v61 = vsel %vm900_vm2, %v923_v53, 0.0  ;;  %v1090_v57 = vld [vmem:[%s6462_s5 + $0x8] sm:$0xff] }
 0x158   :  { %898 = vadd.xlane.f32.xlu0 %v897_v55  ;;  %v941_v62 = vsel %vm900_vm2, %v924_v59, 0.0  ;;  %v5244_v41 = vpop.permute.xlu1 %1022  ;;  %v1089_v55 = vld [vmem:[%s6462_s5] sm:$0xff] }
 0x159   :  { %904 = vadd.xlane.f32.xlu1 %v903_v60  ;;  %v942_v0 = vadd.f32 %v941_v62, %v940_v61  ;;  %v5250_v20 = vpop.permute.xlu0 %1032 }
 0x15c   :  { %938 = vadd.xlane.f32.xlu0 %v937_v63  ;;  %v5248_v19 = vpop.permute.xlu1 %1064  ;;  %v1133_v63 = vsel %vm1131_vm3, %v1089_v55, 0 }
 0x15d   :  { %943 = vadd.xlane.f32.xlu1 %v942_v0  ;;  %v1136_v0 = vsel %vm1131_vm3, %v1090_v57, 0 }
 0x160   :  { %v5252_v26 = vpop.permute.xlu1 %1027 }
 0x16e   :  { %1069 = vperm.xlu1 %4698, %v883_v2  }
 0x172   :  { %1108 = vperm.xlu1 %4698, %v1096_v3   ;;  %1074 = vperm.xlu0 %4697, %v884_v5  }
 0x176   :  { %1118 = vperm.xlu1 %4698, %v1098_v6   ;;  %1103 = vperm.xlu0 %4697, %v1095_v7  }
 0x17a   :  { %1123 = vperm.xlu1 %4698, %v1099_v9   ;;  %1113 = vperm.xlu0 %4697, %v1097_v10   ;;  %v5276_v9 = vand.u32 4294901760, %v1133_v63 }
 0x17e   :  { %2140 = vperm.xlu1 %4698, %v2008_v11   ;;  %1128 = vperm.xlu0 %4697, %v1100_v12   ;;  %v5278_v11 = vand.u32 4294901760, %v1136_v0 }
 0x182   :  { %2182 = vperm.xlu1 %4698, %v2014_v14   ;;  %2145 = vperm.xlu0 %4697, %v2009_v17  }
 0x186   :  { %2187 = vperm.xlu1 %4698, %v2015_v22   ;;  %2150 = vperm.xlu0 %4697, %v2010_v25   ;;  %v1091_v22 = vld [vmem:[%s6462_s5 + $0x10] sm:$0xff] }
 0x18a   :  { %2155 = vperm.xlu1 %4698, %v2011_v28   ;;  %2192 = vperm.xlu0 %4697, %v2016_v30   ;;  %v5286_v30 = vsub.f32 %v1133_v63, %v5276_v9 }
 0x18e   :  { %2197 = vperm.xlu1 %4698, %v2017_v13   ;;  %2165 = vperm.xlu0 %4697, %v2013_v16   ;;  %v5289_v16 = vsub.f32 %v1136_v0, %v5278_v11 }
 0x190   :  { %v1246_v57 = vand.u32 4294901760, %v5289_v16 }
 0x192   :  { %2160 = vperm.xlu1 %4698, %v2012_v18  }
 0x1d1   :  { %v887_v27 = vpop.xlane.xlu0 %886 }
 0x1d2   :  { %v5254_v29 = vmul.f32 0.00390625, %v887_v27 }
 0x1d4   :  { %v951_v39 = vmul.f32 %v5254_v29, %v5254_v29 }
 0x1d5   :  { %v890_v31 = vpop.xlane.xlu1 %889  ;;  %v927_v36 = vpop.xlane.xlu0 %926 }
 0x1d6   :  { %v5256_v38 = vmul.f32 0.00390625, %v890_v31  ;;  %v945_v44 = vmul.f32 0.00390625, %v927_v36  ;;  %v1139_v36 = vsel %vm1131_vm3, %v1091_v22, 0 }
 0x1d8   :  { %v957_v46 = vsub.f32 %v945_v44, %v951_v39  ;;  %v952_v43 = vmul.f32 %v5256_v38, %v5256_v38  ;;  %v969_v39 = vsub.f32 %v5114_v54, %v5254_v29 }
 0x1d9   :  { %v893_v47 = vpop.xlane.xlu1 %892  ;;  %v930_v49 = vpop.xlane.xlu0 %929 }
 0x1da   :  { %v963_v50 = vmax.f32 %v957_v46, 0.0  ;;  %v5260_v42 = vmul.f32 0.00390625, %v893_v47  ;;  %v946_v53 = vmul.f32 0.00390625, %v930_v49  ;;  %v970_v47 = vsub.f32 %v5116_v56, %v5254_v29 }
 0x1db   :  { %v972_v56 = vsub.f32 %v5126_v4, %v5256_v38  ;;  %v5322_v4 = vsub.f32 %v5289_v16, %v1246_v57 }
 0x1dc   :  { %v981_v58 = vadd.f32 1e-05, %v963_v50  ;;  %v958_v59 = vsub.f32 %v946_v53, %v952_v43  ;;  %v953_v60 = vmul.f32 %v5260_v42, %v5260_v42  ;;  %v1235_v50 = vand.u32 4294901760, %v5286_v30 }
 0x1dd   :  { %v933_v61 = vpop.xlane.xlu1 %932  ;;  %v896_v62 = vpop.xlane.xlu0 %895  ;;  %v971_v43 = vsub.f32 %v5124_v1, %v5256_v38  ;;  %v1092_v38 = vld [vmem:[%s6462_s5 + $0x18] sm:$0xff]  ;;  %v973_v22 = vsub.f32 %v5134_v21, %v5260_v42 }
 0x1de   :  { %4699 = vrsqrt.f32 %v981_v58  ;;  %v964_v2 = vmax.f32 %v958_v59, 0.0  ;;  %v947_v3 = vmul.f32 0.00390625, %v933_v61  ;;  %v5274_v5 = vmul.f32 0.00390625, %v896_v62 }
 0x1df   :  { %v5304_v58 = vand.u32 4294901760, %v1139_v36 }
 0x1e0   :  { %v982_v6 = vadd.f32 1e-05, %v964_v2  ;;  %v959_v7 = vsub.f32 %v947_v3, %v953_v60  ;;  %v954_v14 = vmul.f32 %v5274_v5, %v5274_v5  ;;  %v5317_v3 = vsub.f32 %v5286_v30, %v1235_v50 }
 0x1e1   :  { %v936_v10 = vpop.xlane.xlu0 %935 }
 0x1e2   :  { %4701 = vrsqrt.f32 %v982_v6  ;;  %v965_v12 = vmax.f32 %v959_v7, 0.0  ;;  %v948_v17 = vmul.f32 0.00390625, %v936_v10 }
 0x1e4   :  { %v983_v25 = vadd.f32 1e-05, %v965_v12  ;;  %v960_v28 = vsub.f32 %v948_v17, %v954_v14  ;;  %v5330_v17 = vsub.f32 %v1139_v36, %v5304_v58 }
 0x1e5   :  { %v899_v13 = vpop.xlane.xlu0 %898 }
 0x1e6   :  { %4703 = vrsqrt.f32 %v983_v25  ;;  %v966_v18 = vmax.f32 %v960_v28, 0.0  ;;  %v5291_v27 = vmul.f32 0.00390625, %v899_v13  ;;  %v905_v31 = vpop.xlane.xlu1 %904 }
 0x1e7   :  { %v5296_v44 = vmul.f32 0.00390625, %v905_v31  ;;  %v974_v31 = vsub.f32 %v5136_v24, %v5260_v42 }
 0x1e8   :  { %v4700_v46 = vpop.eup %4699  ;;  %v984_v49 = vadd.f32 1e-05, %v966_v18  ;;  %v955_v54 = vmul.f32 %v5291_v27, %v5291_v27 }
 0x1e9   :  { %v993_v53 = vmul.f32 %v4700_v46, %v969_v39  ;;  %v939_v55 = vpop.xlane.xlu0 %938  ;;  %v994_v61 = vmul.f32 %v4700_v46, %v970_v47  ;;  %v956_v29 = vmul.f32 %v5296_v44, %v5296_v44  ;;  %v975_v39 = vsub.f32 %v5144_v35, %v5274_v5  ;;  %v1093_v35 = vld [vmem:[%s6462_s5 + $0x20] sm:$0xff] }
 0x1ea   :  { %4705 = vrsqrt.f32 %v984_v49  ;;  %v949_v59 = vmul.f32 0.00390625, %v939_v55  ;;  %v944_v60 = vpop.xlane.xlu1 %943 }
 0x1eb   :  { %v950_v1 = vmul.f32 0.00390625, %v944_v60  ;;  %v1035_v62 = vmul.f32 %v5234_v23, %v993_v53  ;;  %v1036_v2 = vmul.f32 %v5234_v23, %v994_v61 }
 0x1ec   :  { %v4702_v63 = vpop.eup %4701  ;;  %v961_v0 = vsub.f32 %v949_v59, %v955_v54  ;;  %v976_v59 = vsub.f32 %v5146_v40, %v5274_v5 }
 0x1ed   :  { %v995_v6 = vmul.f32 %v4702_v63, %v971_v43  ;;  %v962_v7 = vsub.f32 %v950_v1, %v956_v29  ;;  %v996_v10 = vmul.f32 %v4702_v63, %v972_v56  ;;  %v1078_v23 = vadd.f32 %v5236_v32, %v1036_v2 }
 0x1ee   :  { %v967_v12 = vmax.f32 %v961_v0, 0.0  ;;  %v1077_v14 = vadd.f32 %v5236_v32, %v1035_v62  ;;  %v1142_v32 = vsel %vm1131_vm3, %v1092_v38, 0  ;;  %v1237_v62 = vand.u32 4294901760, %v5317_v3 }
 0x1ef   :  { %v968_v25 = vmax.f32 %v962_v7, 0.0  ;;  %v1038_v28 = vmul.f32 %v5238_v33, %v996_v10  ;;  %v1037_v13 = vmul.f32 %v5238_v33, %v995_v6  ;;  %v1156_v43 = vand.u32 4294901760, %v1078_v23 }
 0x1f0   :  { %v4704_v18 = vpop.eup %4703  ;;  %v985_v46 = vadd.f32 1e-05, %v967_v12  ;;  %v1158_v53 = vand.u32 4294901760, %v1077_v14  ;;  %v5354_v29 = vand.u32 4294901760, %v1142_v32  ;;  %v1248_v63 = vand.u32 4294901760, %v5322_v4 }
 0x1f1   :  { %v997_v36 = vmul.f32 %v4704_v18, %v973_v22  ;;  %v986_v47 = vadd.f32 1e-05, %v968_v25  ;;  %v1080_v49 = vadd.f32 %v5240_v34, %v1038_v28  ;;  %v1079_v21 = vadd.f32 %v5240_v34, %v1037_v13 }
 0x1f2   :  { %4707 = vrsqrt.f32 %v985_v46  ;;  %v998_v33 = vmul.f32 %v4704_v18, %v974_v31  ;;  %v5359_v0 = vsel %vm1131_vm3, %v1093_v35, 0  ;;  %v1257_v2 = vand.u32 4294901760, %v5330_v17  ;;  %v1070_v35 = vpop.permute.xlu1 %1069 }
 0x1f3   :  { %4709 = vrsqrt.f32 %v986_v47  ;;  %v1160_v55 = vand.u32 4294901760, %v1080_v49  ;;  %v1162_v54 = vand.u32 4294901760, %v1079_v21  ;;  %v1039_v24 = vmul.f32 %v5242_v37, %v997_v36 }
 0x1f4   :  { %v4706_v42 = vpop.eup %4705  ;;  %v1040_v60 = vmul.f32 %v5242_v37, %v998_v33  ;;  %v5366_v6 = vsub.f32 %v1078_v23, %v1156_v43  ;;  %v5371_v10 = vsub.f32 %v1077_v14, %v1158_v53  ;;  %v5378_v25 = vsub.f32 %v1142_v32, %v5354_v29 }
 0x1f5   :  { %v999_v34 = vmul.f32 %v4706_v42, %v975_v39  ;;  %v5350_v61 = vpack.c.bf16 %v1160_v55, %v1156_v43  ;;  %v5352_v56 = vpack.c.bf16 %v1162_v54, %v1158_v53  ;;  %v1000_v1 = vmul.f32 %v4706_v42, %v976_v59 }
 0x1f6   :  { %v1082_v40 = vadd.f32 %v5246_v15, %v1040_v60  ;;  %v1081_v5 = vadd.f32 %v5246_v15, %v1039_v24  ;;  %v5368_v7 = vsub.f32 %v1080_v49, %v1160_v55  ;;  %v5374_v12 = vsub.f32 %v1079_v21, %v1162_v54 }
 0x1f7   :  { %4236 = vmatprep.subr.bf16.mxu1 %v5350_v61  ;;  %v1041_v37 = vmul.f32 %v5244_v41, %v999_v34  ;;  %v1042_v38 = vmul.f32 %v5244_v41, %v1000_v1  ;;  %v5381_v15 = vand.u32 4294901760, %v5359_v0  ;;  %v977_v23 = vsub.f32 %v5156_v45, %v5291_v27 }
 0x1f8   :  { %4238 = vmatpush1.bf16.msra.mxu1 %v5352_v56  ;;  %v978_v28 = vsub.f32 %v5158_v48, %v5291_v27  ;;  %v979_v14 = vsub.f32 %v5160_v51, %v5296_v44  ;;  %v980_v13 = vsub.f32 %v5162_v52, %v5296_v44  ;;  %v1164_v18 = vand.u32 4294901760, %v1082_v40  ;;  %v1094_v48 = vld [vmem:[%s6462_s5 + $0x28] sm:$0x1f] }
 0x1f9   :  { %v1083_v22 = vadd.f32 %v5248_v19, %v1041_v37  ;;  %v1084_v41 = vadd.f32 %v5248_v19, %v1042_v38  ;;  %v1166_v31 = vand.u32 4294901760, %v1081_v5  ;;  %v1301_v36 = vand.u32 4294901760, %v5366_v6  ;;  %v1075_v38 = vpop.permute.xlu0 %1074 }
 0x1fa   :  { %v1313_v45 = vand.u32 4294901760, %v5368_v7  ;;  %v1307_v47 = vand.u32 4294901760, %v5371_v10  ;;  %v1319_v52 = vand.u32 4294901760, %v5374_v12  ;;  %v5407_v54 = vsub.f32 %v1082_v40, %v1164_v18 }
 0x1fb   :  { %v1170_v39 = vand.u32 4294901760, %v1083_v22  ;;  %v1168_v32 = vand.u32 4294901760, %v1084_v41  ;;  %v5410_v24 = vsel %vm1131_vm3, %v1094_v48, 0  ;;  %v4259_v4 = vpack.c.bf16 %v5368_v7, %v5366_v6 }
 0x1fc   :  { %v4708_v46 = vpop.eup %4707  ;;  %v1314_v34 = vsub.f32 %v5368_v7, %v1313_v45  ;;  %v4261_v7 = vpack.c.bf16 %v5374_v12, %v5371_v10 }
 0x1fd   :  { %v4710_v51 = vpop.eup %4709  ;;  %v1001_v19 = vmul.f32 %v4708_v46, %v977_v23  ;;  %v1002_v27 = vmul.f32 %v4708_v46, %v978_v28  ;;  %v5398_v49 = vpack.c.bf16 %v1170_v39, %v1166_v31  ;;  %v5401_v43 = vpack.c.bf16 %v1168_v32, %v1164_v18 }
 0x1fe   :  { %v1003_v44 = vmul.f32 %v4710_v51, %v979_v14  ;;  %v1004_v21 = vmul.f32 %v4710_v51, %v980_v13  ;;  %v5403_v53 = vsub.f32 %v1084_v41, %v1168_v32  ;;  %v5415_v60 = vsub.f32 %v1083_v22, %v1170_v39 }
 0x1ff   :  { %v1043_v33 = vmul.f32 %v5252_v26, %v1001_v19  ;;  %v1044_v55 = vmul.f32 %v5252_v26, %v1002_v27  ;;  %4240 = vmatprep.subr.bf16.mxu1 %v5401_v43  ;;  %v1302_v26 = vsub.f32 %v5366_v6, %v1301_v36  ;;  %v1308_v14 = vsub.f32 %v5371_v10, %v1307_v47 }
 0x200   :  { %v1045_v42 = vmul.f32 %v5250_v20, %v1003_v44  ;;  %v1046_v59 = vmul.f32 %v5250_v20, %v1004_v21  ;;  %4242 = vmatpush1.bf16.msra.mxu1 %v5398_v49  ;;  %v1337_v40 = vand.u32 4294901760, %v5403_v53  ;;  %v1320_v20 = vsub.f32 %v5374_v12, %v1319_v52 }
 0x201   :  { %v1085_v1 = vadd.f32 %v1070_v35, %v1043_v33  ;;  %v1086_v37 = vadd.f32 %v1070_v35, %v1044_v55  ;;  %v5423_v13 = vsub.f32 %v1081_v5, %v1166_v31  ;;  %v1325_v18 = vand.u32 4294901760, %v5407_v54 }
 0x202   :  { %v1087_v23 = vadd.f32 %v1075_v38, %v1045_v42  ;;  %v1088_v28 = vadd.f32 %v1075_v38, %v1046_v59  ;;  %v1315_v32 = vand.u32 4294901760, %v1314_v34  ;;  %v1343_v48 = vand.u32 4294901760, %v5415_v60 }
 0x203   :  { %v1172_v41 = vand.u32 4294901760, %v1086_v37  ;;  %v1174_v22 = vand.u32 4294901760, %v1085_v1  ;;  %v1338_v44 = vsub.f32 %v5403_v53, %v1337_v40  ;;  %v1303_v33 = vand.u32 4294901760, %v1302_v26 }
 0x204   :  { %v1151_v39 = vsel %vm900_vm2, %v1087_v23, 0  ;;  %v1154_v46 = vsel %vm900_vm2, %v1088_v28, 0  ;;  %v1321_v5 = vand.u32 4294901760, %v1320_v20  ;;  %v5434_v31 = vpack.c.bf16 %v1313_v45, %v1301_v36 }
 0x205   :  { %v5429_v51 = vsub.f32 %v1086_v37, %v1172_v41  ;;  %v1176_v19 = vand.u32 4294901760, %v1154_v46  ;;  %v1178_v27 = vand.u32 4294901760, %v1151_v39  ;;  %v5432_v21 = vsub.f32 %v1085_v1, %v1174_v22 }
 0x206   :  { %v1326_v42 = vsub.f32 %v5407_v54, %v1325_v18  ;;  %v1331_v59 = vand.u32 4294901760, %v5423_v13  ;;  %v5447_v1 = vpack.c.bf16 %v1319_v52, %v1307_v47  ;;  %v4247_v26 = vpack.c.bf16 %v1315_v32, %v1303_v33 }
 0x207   :  { %v5436_v55 = vpack.c.bf16 %v1178_v27, %v1174_v22  ;;  %v5438_v35 = vsub.f32 %v1154_v46, %v1176_v19  ;;  %v1349_v34 = vand.u32 4294901760, %v5429_v51  ;;  %v5443_v37 = vsub.f32 %v1151_v39, %v1178_v27 }
 0x208   :  { %v5445_v38 = vpack.c.bf16 %v1176_v19, %v1172_v41  ;;  %v1339_v23 = vand.u32 4294901760, %v1338_v44  ;;  %v1344_v36 = vsub.f32 %v5415_v60, %v1343_v48  ;;  %v1355_v28 = vand.u32 4294901760, %v5432_v21 }
 0x209   :  { %v1361_v45 = vand.u32 4294901760, %v5438_v35  ;;  %v1367_v20 = vand.u32 4294901760, %v5443_v37  ;;  %v5454_v22 = vpack.c.bf16 %v1337_v40, %v1325_v18  ;;  %v5456_v39 = vpack.c.bf16 %v1343_v48, %v1331_v59 }
 0x20a   :  { %4244 = vmatprep.subr.bf16.mxu1 %v5445_v38  ;;  %v1309_v47 = vand.u32 4294901760, %v1308_v14  ;;  %v1332_v52 = vsub.f32 %v5423_v13, %v1331_v59  ;;  %v1327_v32 = vand.u32 4294901760, %v1326_v42  ;;  %v1350_v19 = vsub.f32 %v5429_v51, %v1349_v34 }
 0x20b   :  { %4246 = vmatpush1.bf16.msra.mxu1 %v5436_v55  ;;  %v1362_v41 = vsub.f32 %v5438_v35, %v1361_v45  ;;  %v5461_v46 = vpack.c.bf16 %v1361_v45, %v1349_v34  ;;  %v1258_v40 = vsub.f32 %v5330_v17, %v1257_v2  ;;  %v5467_v18 = vpack.c.bf16 %v1367_v20, %v1355_v28 }
 0x20c   :  { %4248 = vmatprep.subr.bf16.mxu1 %v4247_v26  ;;  %v1368_v48 = vsub.f32 %v5443_v37, %v1367_v20  ;;  %v4249_v27 = vpack.c.bf16 %v1321_v5, %v1309_v47  ;;  %v1345_v14 = vand.u32 4294901760, %v1344_v36  ;;  %v1268_v44 = vand.u32 4294901760, %v5378_v25 }
 0x20d   :  { %v4251_v33 = vpack.c.bf16 %v1339_v23, %v1327_v32  ;;  %v1363_v59 = vand.u32 4294901760, %v1362_v41  ;;  %v5475_v42 = vsub.f32 %v5359_v0, %v5381_v15  ;;  %v5478_v34 = vand.u32 4294901760, %v5410_v24 }
 0x20e   :  { %1238 = vmatmul.mubr.f32.vlgmr.msra.gmra.mrb[12].mxu1 %v1237_v62  ;;  %v1356_v26 = vsub.f32 %v5432_v21, %v1355_v28  ;;  %v1333_v5 = vand.u32 4294901760, %v1332_v52  ;;  %v1351_v36 = vand.u32 4294901760, %v1350_v19  ;;  %v1259_v3 = vand.u32 4294901760, %v1258_v40 }
 0x20f   :  { %4250 = vmatpush1.bf16.msra.mxu1 %v4249_v27  ;;  %1243 = vmatprep.mubr.f32.mxu1 %v4763_v8  ;;  %v1369_v62 = vand.u32 4294901760, %v1368_v48  ;;  %v1269_v0 = vsub.f32 %v5378_v25, %v1268_v44  ;;  %v1279_v20 = vand.u32 4294901760, %v5475_v42  ;;  %v5490_v28 = vsub.f32 %v5410_v24, %v5478_v34 }
 0x210   :  { %4252 = vmatprep.subr.bf16.mxu1 %v4251_v33  ;;  %v4253_v45 = vpack.c.bf16 %v1345_v14, %v1333_v5  ;;  %v4255_v23 = vpack.c.bf16 %v1363_v59, %v1351_v36  ;;  %v1357_v47 = vand.u32 4294901760, %v1356_v26  ;;  %v4263_v40 = vpack.c.bf16 %v5403_v53, %v5407_v54 }
 0x211   :  { %v1280_v41 = vsub.f32 %v5475_v42, %v1279_v20  ;;  %v1290_v32 = vand.u32 4294901760, %v5490_v28  ;;  %v4265_v48 = vpack.c.bf16 %v5415_v60, %v5423_v13  ;;  %v4267_v27 = vpack.c.bf16 %v5438_v35, %v5429_v51 }
 0x212   :  { %1249 = vmatmul.mubr.f32.gmra.mrb[14].mxu1 %v1248_v63  ;;  %v4257_v52 = vpack.c.bf16 %v1369_v62, %v1357_v47  ;;  %v1270_v63 = vand.u32 4294901760, %v1269_v0  ;;  %v4269_v10 = vpack.c.bf16 %v5443_v37, %v5432_v21 }
 0x213   :  { %4254 = vmatpush1.bf16.msra.mxu1 %v4253_v45  ;;  %1254 = vmatprep.mubr.f32.mxu1 %v4763_v8  ;;  %v1281_v24 = vand.u32 4294901760, %v1280_v41  ;;  %v1291_v19 = vsub.f32 %v5490_v28, %v1290_v32 }
 0x214   :  { %4256 = vmatprep.subr.bf16.mxu1 %v4255_v23 }
 0x215   :  { %v1292_v6 = vand.u32 4294901760, %v1291_v19 }
 0x216   :  { %1260 = vmatmul.mubr.f32.gmra.mrb[16].mxu1 %v1259_v3 }
 0x217   :  { %4258 = vmatpush1.bf16.msra.mxu1 %v4257_v52  ;;  %1265 = vmatprep.mubr.f32.mxu1 %v4763_v8 }
 0x218   :  { %4260 = vmatprep.subr.bf16.mxu1 %v4259_v4 }
 0x21a   :  { %1271 = vmatmul.mubr.f32.gmra.mrb[18].mxu1 %v1270_v63 }
 0x21b   :  { %1276 = vmatprep.mubr.f32.mxu1 %v4763_v8 }
 0x21e   :  { %1282 = vmatmul.mubr.f32.gmra.mrb[20].mxu1 %v1281_v24 }
 0x21f   :  { %1287 = vmatprep.mubr.f32.mxu1 %v4763_v8 }
 0x222   :  { %1293 = vmatmul.mubr.f32.gmra.mrb[22].mxu1 %v1292_v6 }
 0x223   :  { %1423 = vmatprep.mubr.f32.mxu1 %v4763_v8 }
 0x226   :  { %1425 = vmatmul.mubr.f32.vlgmr.msra.gmra.mrb[12].mxu1 %v5276_v9 }
 0x227   :  { %4262 = vmatpush1.bf16.msra.mxu1 %v4261_v7  ;;  %1430 = vmatprep.mubr.f32.mxu1 %v4763_v8 }
 0x228   :  { %4264 = vmatprep.subr.bf16.mxu1 %v4263_v40 }
 0x22a   :  { %1432 = vmatmul.mubr.f32.gmra.mrb[14].mxu1 %v5278_v11 }
 0x22b   :  { %4266 = vmatpush1.bf16.msra.mxu1 %v4265_v48  ;;  %1437 = vmatprep.mubr.f32.mxu1 %v4763_v8 }
 0x22c   :  { %4268 = vmatprep.subr.bf16.mxu1 %v4267_v27 }
 0x22e   :  { %1439 = vmatmul.mubr.f32.gmra.mrb[16].mxu1 %v5304_v58 }
 0x22f   :  { %4270 = vmatpush1.bf16.msra.mxu1 %v4269_v10  ;;  %1444 = vmatprep.mubr.f32.mxu1 %v4763_v8 }
 0x230   :  { %4272 = vmatprep.subr.bf16.mxu1 %v5350_v61 }
 0x232   :  { %1446 = vmatmul.mubr.f32.gmra.mrb[18].mxu1 %v5354_v29 }
 0x233   :  { %1451 = vmatprep.mubr.f32.mxu1 %v4763_v8 }
 0x236   :  { %1453 = vmatmul.mubr.f32.gmra.mrb[20].mxu1 %v5381_v15 }
 0x237   :  { %1458 = vmatprep.mubr.f32.mxu1 %v4763_v8 }
 0x23a   :  { %1460 = vmatmul.mubr.f32.gmra.mrb[22].mxu1 %v5478_v34 }
 0x23b   :  { %1554 = vmatprep.mubr.f32.mxu1 %v4763_v8 }
 0x23e   :  { %1557 = vmatmul.mubr.f32.vlgmr.msra.gmra.mrb[12].mxu1 %v5286_v30 }
 0x23f   :  { %4274 = vmatpush1.bf16.msra.mxu1 %v5352_v56  ;;  %1562 = vmatprep.mubr.f32.mxu1 %v4763_v8 }
 0x240   :  { %4276 = vmatprep.subr.bf16.mxu1 %v5401_v43 }
 0x242   :  { %1565 = vmatmul.mubr.f32.gmra.mrb[14].mxu1 %v5289_v16 }
 0x243   :  { %4278 = vmatpush1.bf16.msra.mxu1 %v5398_v49  ;;  %1570 = vmatprep.mubr.f32.mxu1 %v4763_v8 }
 0x244   :  { %4280 = vmatprep.subr.bf16.mxu1 %v5445_v38 }
 0x246   :  { %1573 = vmatmul.mubr.f32.gmra.mrb[16].mxu1 %v5330_v17 }
 0x247   :  { %4282 = vmatpush1.bf16.msra.mxu1 %v5436_v55  ;;  %1578 = vmatprep.mubr.f32.mxu1 %v4763_v8 }
 0x248   :  { %4284 = vmatprep.subr.bf16.mxu1 %v5434_v31 }
 0x24a   :  { %1581 = vmatmul.mubr.f32.gmra.mrb[18].mxu1 %v5378_v25 }
 0x24b   :  { %1586 = vmatprep.mubr.f32.mxu1 %v4763_v8 }
 0x24e   :  { %1589 = vmatmul.mubr.f32.gmra.mrb[20].mxu1 %v5475_v42 }
 0x24f   :  { %1594 = vmatprep.mubr.f32.mxu1 %v4763_v8 }
 0x252   :  { %1597 = vmatmul.mubr.f32.gmra.mrb[22].mxu1 %v5490_v28 }
 0x253   :  { %1679 = vmatprep.mubr.f32.mxu1 %v4763_v8 }
 0x256   :  { %1683 = vmatmul.mubr.f32.vlgmr.msra.gmra.mrb[12].mxu1 %v1235_v50 }
 0x257   :  { %4286 = vmatpush1.bf16.msra.mxu1 %v5447_v1  ;;  %1688 = vmatprep.mubr.f32.mxu1 %v4763_v8 }
 0x258   :  { %4288 = vmatprep.subr.bf16.mxu1 %v5454_v22 }
 0x25a   :  { %1692 = vmatmul.mubr.f32.gmra.mrb[14].mxu1 %v1246_v57 }
 0x25b   :  { %4290 = vmatpush1.bf16.msra.mxu1 %v5456_v39  ;;  %1697 = vmatprep.mubr.f32.mxu1 %v4763_v8 }
 0x25c   :  { %4292 = vmatprep.subr.bf16.mxu1 %v5461_v46 }
 0x25e   :  { %1701 = vmatmul.mubr.f32.gmra.mrb[16].mxu1 %v1257_v2 }
 0x25f   :  { %4294 = vmatpush1.bf16.msra.mxu1 %v5467_v18  ;;  %1706 = vmatprep.mubr.f32.mxu1 %v4763_v8 }
 0x260   :  { %4296 = vmatprep.subr.bf16.mxu1 %v5350_v61 }
 0x262   :  { %1710 = vmatmul.mubr.f32.gmra.mrb[18].mxu1 %v1268_v44 }
 0x263   :  { %1715 = vmatprep.mubr.f32.mxu1 %v4763_v8 }
 0x266   :  { %1719 = vmatmul.mubr.f32.gmra.mrb[20].mxu1 %v1279_v20 }
 0x267   :  { %1724 = vmatprep.mubr.f32.mxu1 %v4763_v8 }
 0x26a   :  { %1728 = vmatmul.mubr.f32.gmra.mrb[22].mxu1 %v1290_v32 }
 0x26b   :  { %1834 = vmatprep.mubr.f32.mxu1 %v4763_v8 }
 0x26e   :  { %1836 = vmatmul.mubr.f32.vlgmr.msra.gmra.mrb[12].mxu1 %v5276_v9 }
 0x26f   :  { %4298 = vmatpush1.bf16.msra.mxu1 %v5352_v56  ;;  %1841 = vmatprep.mubr.f32.mxu1 %v4763_v8 }
 0x270   :  { %4300 = vmatprep.subr.bf16.mxu1 %v5401_v43 }
 0x272   :  { %1843 = vmatmul.mubr.f32.gmra.mrb[14].mxu1 %v5278_v11 }
 0x273   :  { %4302 = vmatpush1.bf16.msra.mxu1 %v5398_v49  ;;  %1848 = vmatprep.mubr.f32.mxu1 %v4763_v8 }
 0x274   :  { %4304 = vmatprep.subr.bf16.mxu1 %v5445_v38 }
 0x276   :  { %1850 = vmatmul.mubr.f32.gmra.mrb[16].mxu1 %v5304_v58 }
 0x277   :  { %4306 = vmatpush1.bf16.msra.mxu1 %v5436_v55  ;;  %1855 = vmatprep.mubr.f32.mxu1 %v4763_v8 }
 0x27a   :  { %1857 = vmatmul.mubr.f32.gmra.mrb[18].mxu1 %v5354_v29 }
 0x27b   :  { %1862 = vmatprep.mubr.f32.mxu1 %v4763_v8 }
 0x27e   :  { %1864 = vmatmul.mubr.f32.gmra.mrb[20].mxu1 %v5381_v15 }
 0x27f   :  { %1869 = vmatprep.mubr.f32.mxu1 %v4763_v8 }
 0x282   :  { %1871 = vmatmul.mubr.f32.gmra.mrb[22].mxu1 %v5478_v34 }
 0x283   :  { %1953 = vmatprep.mubr.f32.mxu1 %v4763_v8 }
 0x286   :  { %1955 = vmatmul.mubr.f32.vlgmr.msra.gmra.mrb[12].mxu1 %v5276_v9  ;;  %v1104_v9 = vpop.permute.xlu0 %1103 }
 0x287   :  { %1960 = vmatprep.mubr.f32.mxu1 %v4763_v8 }
 0x28a   :  { %1962 = vmatmul.mubr.f32.gmra.mrb[14].mxu1 %v5278_v11  ;;  %v1114_v43 = vpop.permute.xlu0 %1113 }
 0x28b   :  { %1967 = vmatprep.mubr.f32.mxu1 %v4763_v8 }
 0x28e   :  { %1969 = vmatmul.mubr.f32.gmra.mrb[16].mxu1 %v5304_v58  ;;  %v1109_v58 = vpop.permute.xlu1 %1108  ;;  %v1129_v28 = vpop.permute.xlu0 %1128 }
 0x28f   :  { %1974 = vmatprep.mubr.f32.mxu1 %v4763_v8 }
 0x292   :  { %1976 = vmatmul.mubr.f32.gmra.mrb[18].mxu1 %v5354_v29  ;;  %v1119_v21 = vpop.permute.xlu1 %1118 }
 0x293   :  { %1981 = vmatprep.mubr.f32.mxu1 %v4763_v8 }
 0x296   :  { %1983 = vmatmul.mubr.f32.gmra.mrb[20].mxu1 %v5381_v15 }
 0x297   :  { %1988 = vmatprep.mubr.f32.mxu1 %v4763_v8 }
 0x29a   :  { %1990 = vmatmul.mubr.f32.gmra.mrb[22].mxu1 %v5478_v34  ;;  %v1124_v34 = vpop.permute.xlu1 %1123 }
 0x29b   :  { %3460 = vmatprep.mubr.f32.mxu1 %v4763_v8 }
 0x359   :  { %v1956_v11 = vpop.f32.mrb[12].mxu1 }
 0x35a   :  { %v4477_v30 = vadd.f32 %v1956_v11, %v1104_v9  ;;  %v1958_v16 = vpop.f32.mrb[13].mxu1 }
 0x35b   :  { %v4478_v50 = vadd.f32 %v1958_v16, %v1104_v9 }
 0x35c   :  { %v5600_v57 = vmax.f32 %v4477_v30, 0.0 }
 0x35d   :  { %v5602_v17 = vmax.f32 %v4478_v50, 0.0  ;;  %v1963_v61 = vpop.f32.mrb[14].mxu1 }
 0x35e   :  { %v4479_v56 = vadd.f32 %v1963_v61, %v1109_v58  ;;  %v1965_v29 = vpop.f32.mrb[15].mxu1  ;;  %v2046_v2 = vmul.f32 %v5600_v57, %v5600_v57 }
 0x35f   :  { %v4480_v12 = vadd.f32 %v1965_v29, %v1109_v58  ;;  %v2020_v25 = vadd.f32 %v5602_v17, %v5600_v57  ;;  %v2047_v15 = vmul.f32 %v5602_v17, %v5602_v17  ;;  %v2019_v29 = vld [vmem:[%s6465_s8 + $0x28] sm:$0x1f] }
 0x360   :  { %v5610_v49 = vmax.f32 %v4479_v56, 0.0  ;;  %v2018_v56 = vld [vmem:[%s6465_s8 + $0x20] sm:$0xff] }
 0x361   :  { %v5612_v53 = vmax.f32 %v4480_v12, 0.0  ;;  %v1970_v54 = vpop.f32.mrb[16].mxu1  ;;  %2021 = vadd.xlane.f32.xlu0 %v2020_v25  ;;  %v2058_v51 = vadd.f32 %v2047_v15, %v2046_v2  ;;  %v4194_v2 = vld [vmem:[%s6463_s6 + $0x38] sm:$0xff]  ;;  %v4193_v12 = vld [vmem:[%s6463_s6 + $0x30] sm:$0xff]  ;;  %v4196_v25 = vld [vmem:[%s6463_s6 + $0x48] sm:$0xff] }
 0x362   :  { %v4481_v60 = vadd.f32 %v1970_v54, %v1114_v43  ;;  %v1972_v13 = vpop.f32.mrb[17].mxu1  ;;  %v2048_v35 = vmul.f32 %v5610_v49, %v5610_v49  ;;  %v4195_v15 = vld [vmem:[%s6463_s6 + $0x40] sm:$0xff]  ;;  %v4198_v54 = vld [vmem:[%s6463_s6 + $0x58] sm:$0x1f] }
 0x363   :  { %v4482_v31 = vadd.f32 %v1972_v13, %v1114_v43  ;;  %v2023_v55 = vadd.f32 %v5612_v53, %v5610_v49  ;;  %v2049_v37 = vmul.f32 %v5612_v53, %v5612_v53  ;;  %v4197_v43 = vld [vmem:[%s6463_s6 + $0x50] sm:$0xff]  ;;  %v4200_v13 = vld [vmem:[%s6464_s7 + $0x38] sm:$0xff] }
 0x364   :  { %v5620_v38 = vmax.f32 %v4481_v60, 0.0  ;;  %v4199_v60 = vld [vmem:[%s6464_s7 + $0x30] sm:$0xff] }
 0x365   :  { %v5622_v1 = vmax.f32 %v4482_v31, 0.0  ;;  %v1977_v22 = vpop.f32.mrb[18].mxu1  ;;  %2024 = vadd.xlane.f32.xlu1 %v2023_v55  ;;  %2059 = vadd.xlane.f32.xlu0 %v2058_v51  ;;  %v2061_v44 = vadd.f32 %v2049_v37, %v2048_v35  ;;  %v4205_v51 = vld [vmem:[%s6465_s8 + $0x30] sm:$0xff]  ;;  %v4206_v31 = vld [vmem:[%s6465_s8 + $0x38] sm:$0xff]  ;;  %v4207_v55 = vld [vmem:[%s6465_s8 + $0x40] sm:$0xff] }
 0x366   :  { %v4483_v39 = vadd.f32 %v1977_v22, %v1119_v21  ;;  %v1979_v46 = vpop.f32.mrb[19].mxu1  ;;  %v2050_v18 = vmul.f32 %v5620_v38, %v5620_v38  ;;  %v4202_v35 = vld [vmem:[%s6464_s7 + $0x48] sm:$0xff]  ;;  %v4204_v37 = vld [vmem:[%s6464_s7 + $0x58] sm:$0x1f] }
 0x367   :  { %v4484_v14 = vadd.f32 %v1979_v46, %v1119_v21  ;;  %v2026_v33 = vadd.f32 %v5622_v1, %v5620_v38  ;;  %v2051_v59 = vmul.f32 %v5622_v1, %v5622_v1  ;;  %v4201_v21 = vld [vmem:[%s6464_s7 + $0x40] sm:$0xff]  ;;  %v4208_v22 = vld [vmem:[%s6465_s8 + $0x48] sm:$0xff]  ;;  %v5718_v46 = vpop.permute.xlu1 %2140 }
 0x368   :  { %v5630_v42 = vmax.f32 %v4483_v39, 0.0  ;;  %v4203_v39 = vld [vmem:[%s6464_s7 + $0x50] sm:$0xff] }
 0x369   :  { %v5632_v26 = vmax.f32 %v4484_v14, 0.0  ;;  %v1984_v5 = vpop.f32.mrb[20].mxu1  ;;  %2062 = vadd.xlane.f32.xlu0 %v2061_v44  ;;  %2027 = vadd.xlane.f32.xlu1 %v2026_v33  ;;  %v2064_v3 = vadd.f32 %v2051_v59, %v2050_v18  ;;  %v5722_v14 = vpop.permute.xlu0 %2145 }
 0x36a   :  { %v4485_v36 = vadd.f32 %v1984_v5, %v1124_v34  ;;  %v1986_v45 = vpop.f32.mrb[21].mxu1  ;;  %v2052_v0 = vmul.f32 %v5630_v42, %v5630_v42 }
 0x36b   :  { %v4486_v62 = vadd.f32 %v1986_v45, %v1124_v34  ;;  %v2029_v23 = vadd.f32 %v5632_v26, %v5630_v42  ;;  %v2053_v20 = vmul.f32 %v5632_v26, %v5632_v26  ;;  %v5720_v18 = vpop.permute.xlu1 %2182 }
 0x36c   :  { %v5640_v52 = vmax.f32 %v4485_v36, 0.0 }
 0x36d   :  { %v1991_v47 = vpop.f32.mrb[22].mxu1  ;;  %2030 = vadd.xlane.f32.xlu0 %v2029_v23  ;;  %2065 = vadd.xlane.f32.xlu1 %v2064_v3  ;;  %v5642_v41 = vmax.f32 %v4486_v62, 0.0  ;;  %v2067_v24 = vadd.f32 %v2053_v20, %v2052_v0  ;;  %v5726_v33 = vpop.permute.xlu0 %2150 }
 0x36e   :  { %v4487_v4 = vadd.f32 %v1991_v47, %v1129_v28  ;;  %v1993_v63 = vpop.f32.mrb[23].mxu1  ;;  %v2054_v40 = vmul.f32 %v5640_v52, %v5640_v52 }
 0x36f   :  { %v4488_v32 = vadd.f32 %v1993_v63, %v1129_v28  ;;  %v2032_v27 = vadd.f32 %v5642_v41, %v5640_v52  ;;  %v2055_v9 = vmul.f32 %v5642_v41, %v5642_v41  ;;  %v5724_v44 = vpop.permute.xlu1 %2187 }
 0x370   :  { %v5644_v19 = vmax.f32 %v4487_v4, 0.0 }
 0x371   :  { %v5646_v6 = vmax.f32 %v4488_v32, 0.0  ;;  %2068 = vadd.xlane.f32.xlu0 %v2067_v24  ;;  %v2070_v58 = vadd.f32 %v2055_v9, %v2054_v40  ;;  %v5730_v34 = vpop.permute.xlu0 %2192 }
 0x372   :  { %v2035_v7 = vsel %vm900_vm2, %v5644_v19, 0.0  ;;  %v2056_v48 = vmul.f32 %v5644_v19, %v5644_v19 }
 0x373   :  { %v2036_v10 = vsel %vm900_vm2, %v5646_v6, 0.0  ;;  %v2057_v11 = vmul.f32 %v5646_v6, %v5646_v6  ;;  %v5728_v59 = vpop.permute.xlu1 %2155 }
 0x374   :  { %v2037_v30 = vadd.f32 %v2036_v10, %v2035_v7  ;;  %v2073_v16 = vsel %vm900_vm2, %v2056_v48, 0.0  ;;  %v4188_v10 = vld [vmem:[%s6462_s5 + $0x38] sm:$0xff] }
 0x375   :  { %2033 = vadd.xlane.f32.xlu0 %v2032_v27  ;;  %v2074_v50 = vsel %vm900_vm2, %v2057_v11, 0.0  ;;  %v5734_v36 = vpop.permute.xlu0 %2165  ;;  %v4187_v27 = vld [vmem:[%s6462_s5 + $0x30] sm:$0xff] }
 0x376   :  { %2038 = vadd.xlane.f32.xlu1 %v2037_v30  ;;  %v2075_v61 = vadd.f32 %v2074_v50, %v2073_v16 }
 0x377   :  { %v5732_v5 = vpop.permute.xlu1 %2197 }
 0x379   :  { %2071 = vadd.xlane.f32.xlu0 %v2070_v58  ;;  %v2267_v58 = vsel %vm1131_vm3, %v4187_v27, 0 }
 0x37a   :  { %2076 = vadd.xlane.f32.xlu1 %v2075_v61  ;;  %v2270_v61 = vsel %vm1131_vm3, %v4188_v10, 0 }
 0x37b   :  { %v5736_v45 = vpop.permute.xlu1 %2160 }
 0x38b   :  { %2202 = vperm.xlu1 %4698, %v2018_v56  }
 0x38f   :  { %2207 = vperm.xlu0 %4697, %v2019_v29   ;;  %2243 = vperm.xlu1 %4698, %v4194_v2  }
 0x393   :  { %2238 = vperm.xlu0 %4697, %v4193_v12   ;;  %2253 = vperm.xlu1 %4698, %v4196_v25  }
 0x397   :  { %2248 = vperm.xlu0 %4697, %v4195_v15   ;;  %2258 = vperm.xlu1 %4698, %v4197_v43   ;;  %v5756_v15 = vand.u32 4294901760, %v2267_v58 }
 0x39b   :  { %2263 = vperm.xlu0 %4697, %v4198_v54   ;;  %3276 = vperm.xlu1 %4698, %v4199_v60   ;;  %v5758_v54 = vand.u32 4294901760, %v2270_v61 }
 0x39f   :  { %3281 = vperm.xlu0 %4697, %v4200_v13   ;;  %3318 = vperm.xlu1 %4698, %v4205_v51  }
 0x3a3   :  { %3286 = vperm.xlu0 %4697, %v4201_v21   ;;  %3323 = vperm.xlu1 %4698, %v4206_v31   ;;  %v4189_v21 = vld [vmem:[%s6462_s5 + $0x40] sm:$0xff] }
 0x3a7   :  { %3328 = vperm.xlu0 %4697, %v4207_v55   ;;  %3291 = vperm.xlu1 %4698, %v4202_v35   ;;  %v5766_v35 = vsub.f32 %v2267_v58, %v5756_v15 }
 0x3ab   :  { %3301 = vperm.xlu0 %4697, %v4204_v37   ;;  %3333 = vperm.xlu1 %4698, %v4208_v22   ;;  %v5769_v22 = vsub.f32 %v2270_v61, %v5758_v54 }
 0x3ad   :  { %v2380_v10 = vand.u32 4294901760, %v5769_v22 }
 0x3af   :  { %3296 = vperm.xlu1 %4698, %v4203_v39  }
 0x3ee   :  { %v2022_v3 = vpop.xlane.xlu0 %2021 }
 0x3ef   :  { %v2040_v62 = vmul.f32 0.00390625, %v2022_v3 }
 0x3f1   :  { %v2084_v28 = vmul.f32 %v2040_v62, %v2040_v62 }
 0x3f2   :  { %v2025_v23 = vpop.xlane.xlu1 %2024  ;;  %v2060_v0 = vpop.xlane.xlu0 %2059 }
 0x3f3   :  { %v5738_v20 = vmul.f32 0.00390625, %v2025_v23  ;;  %v2078_v47 = vmul.f32 0.00390625, %v2060_v0  ;;  %v2273_v0 = vsel %vm1131_vm3, %v4189_v21, 0 }
 0x3f5   :  { %v2090_v4 = vsub.f32 %v2078_v47, %v2084_v28  ;;  %v2085_v40 = vmul.f32 %v5738_v20, %v5738_v20  ;;  %v2102_v28 = vsub.f32 %v5600_v57, %v2040_v62 }
 0x3f6   :  { %v2028_v63 = vpop.xlane.xlu1 %2027  ;;  %v2063_v32 = vpop.xlane.xlu0 %2062 }
 0x3f7   :  { %v2096_v24 = vmax.f32 %v2090_v4, 0.0  ;;  %v5740_v7 = vmul.f32 0.00390625, %v2028_v63  ;;  %v2079_v48 = vmul.f32 0.00390625, %v2063_v32  ;;  %v2103_v63 = vsub.f32 %v5602_v17, %v2040_v62 }
 0x3f8   :  { %v2105_v17 = vsub.f32 %v5612_v53, %v5738_v20  ;;  %v5800_v53 = vsub.f32 %v5769_v22, %v2380_v10 }
 0x3f9   :  { %v2114_v9 = vadd.f32 1e-05, %v2096_v24  ;;  %v2091_v11 = vsub.f32 %v2079_v48, %v2085_v40  ;;  %v2086_v30 = vmul.f32 %v5740_v7, %v5740_v7  ;;  %v2369_v24 = vand.u32 4294901760, %v5766_v35 }
 0x3fa   :  { %v2066_v16 = vpop.xlane.xlu1 %2065  ;;  %v2031_v50 = vpop.xlane.xlu0 %2030  ;;  %v2104_v40 = vsub.f32 %v5610_v49, %v5738_v20  ;;  %v4190_v20 = vld [vmem:[%s6462_s5 + $0x48] sm:$0xff]  ;;  %v2106_v21 = vsub.f32 %v5620_v38, %v5740_v7 }
 0x3fb   :  { %4711 = vrsqrt.f32 %v2114_v9  ;;  %v2097_v56 = vmax.f32 %v2091_v11, 0.0  ;;  %v2080_v29 = vmul.f32 0.00390625, %v2066_v16  ;;  %v5754_v2 = vmul.f32 0.00390625, %v2031_v50 }
 0x3fc   :  { %v5782_v9 = vand.u32 4294901760, %v2273_v0 }
 0x3fd   :  { %v2115_v12 = vadd.f32 1e-05, %v2097_v56  ;;  %v2092_v25 = vsub.f32 %v2080_v29, %v2086_v30  ;;  %v2087_v13 = vmul.f32 %v5754_v2, %v5754_v2  ;;  %v5795_v29 = vsub.f32 %v5766_v35, %v2369_v24 }
 0x3fe   :  { %v2069_v43 = vpop.xlane.xlu0 %2068 }
 0x3ff   :  { %4713 = vrsqrt.f32 %v2115_v12  ;;  %v2098_v60 = vmax.f32 %v2092_v25, 0.0  ;;  %v2081_v51 = vmul.f32 0.00390625, %v2069_v43 }
 0x401   :  { %v2116_v31 = vadd.f32 1e-05, %v2098_v60  ;;  %v2093_v55 = vsub.f32 %v2081_v51, %v2087_v13  ;;  %v5808_v51 = vsub.f32 %v2273_v0, %v5782_v9 }
 0x402   :  { %v2034_v37 = vpop.xlane.xlu0 %2033 }
 0x403   :  { %4715 = vrsqrt.f32 %v2116_v31  ;;  %v2099_v39 = vmax.f32 %v2093_v55, 0.0  ;;  %v5771_v3 = vmul.f32 0.00390625, %v2034_v37  ;;  %v2039_v23 = vpop.xlane.xlu1 %2038 }
 0x404   :  { %v5775_v47 = vmul.f32 0.00390625, %v2039_v23  ;;  %v2107_v23 = vsub.f32 %v5622_v1, %v5740_v7 }
 0x405   :  { %v4712_v4 = vpop.eup %4711  ;;  %v2117_v32 = vadd.f32 1e-05, %v2099_v39  ;;  %v2088_v57 = vmul.f32 %v5771_v3, %v5771_v3 }
 0x406   :  { %v2126_v48 = vmul.f32 %v4712_v4, %v2102_v28  ;;  %v2072_v27 = vpop.xlane.xlu0 %2071  ;;  %v2127_v16 = vmul.f32 %v4712_v4, %v2103_v63  ;;  %v2089_v62 = vmul.f32 %v5775_v47, %v5775_v47  ;;  %v2108_v28 = vsub.f32 %v5630_v42, %v5754_v2  ;;  %v4191_v42 = vld [vmem:[%s6462_s5 + $0x50] sm:$0xff] }
 0x407   :  { %4717 = vrsqrt.f32 %v2117_v32  ;;  %v2082_v11 = vmul.f32 0.00390625, %v2072_v27  ;;  %v2077_v30 = vpop.xlane.xlu1 %2076 }
 0x408   :  { %v2083_v49 = vmul.f32 0.00390625, %v2077_v30  ;;  %v2168_v50 = vmul.f32 %v5718_v46, %v2126_v48  ;;  %v2169_v56 = vmul.f32 %v5718_v46, %v2127_v16 }
 0x409   :  { %v4714_v58 = vpop.eup %4713  ;;  %v2094_v61 = vsub.f32 %v2082_v11, %v2088_v57  ;;  %v2109_v11 = vsub.f32 %v5632_v26, %v5754_v2 }
 0x40a   :  { %v2128_v12 = vmul.f32 %v4714_v58, %v2104_v40  ;;  %v2095_v25 = vsub.f32 %v2083_v49, %v2089_v62  ;;  %v2129_v43 = vmul.f32 %v4714_v58, %v2105_v17  ;;  %v2211_v46 = vadd.f32 %v5720_v18, %v2169_v56 }
 0x40b   :  { %v2100_v60 = vmax.f32 %v2094_v61, 0.0  ;;  %v2210_v13 = vadd.f32 %v5720_v18, %v2168_v50  ;;  %v2276_v18 = vsel %vm1131_vm3, %v4190_v20, 0  ;;  %v2371_v50 = vand.u32 4294901760, %v5795_v29 }
 0x40c   :  { %v2101_v31 = vmax.f32 %v2095_v25, 0.0  ;;  %v2171_v55 = vmul.f32 %v5722_v14, %v2129_v43  ;;  %v2170_v37 = vmul.f32 %v5722_v14, %v2128_v12  ;;  %v2290_v40 = vand.u32 4294901760, %v2211_v46 }
 0x40d   :  { %v4716_v39 = vpop.eup %4715  ;;  %v2118_v4 = vadd.f32 1e-05, %v2100_v60  ;;  %v2292_v48 = vand.u32 4294901760, %v2210_v13  ;;  %v5832_v62 = vand.u32 4294901760, %v2276_v18  ;;  %v2382_v58 = vand.u32 4294901760, %v5800_v53 }
 0x40e   :  { %v2130_v0 = vmul.f32 %v4716_v39, %v2106_v21  ;;  %v2119_v63 = vadd.f32 1e-05, %v2101_v31  ;;  %v2213_v32 = vadd.f32 %v5724_v44, %v2171_v55  ;;  %v2212_v38 = vadd.f32 %v5724_v44, %v2170_v37 }
 0x40f   :  { %4719 = vrsqrt.f32 %v2118_v4  ;;  %v2131_v14 = vmul.f32 %v4716_v39, %v2107_v23  ;;  %v5837_v61 = vsel %vm1131_vm3, %v4191_v42, 0  ;;  %v2391_v56 = vand.u32 4294901760, %v5808_v51  ;;  %v2203_v42 = vpop.permute.xlu1 %2202 }
 0x410   :  { %4721 = vrsqrt.f32 %v2119_v63  ;;  %v2294_v27 = vand.u32 4294901760, %v2213_v32  ;;  %v2296_v57 = vand.u32 4294901760, %v2212_v38  ;;  %v2172_v1 = vmul.f32 %v5726_v33, %v2130_v0 }
 0x411   :  { %v4718_v7 = vpop.eup %4717  ;;  %v2173_v30 = vmul.f32 %v5726_v33, %v2131_v14  ;;  %v5844_v12 = vsub.f32 %v2211_v46, %v2290_v40  ;;  %v5849_v43 = vsub.f32 %v2210_v13, %v2292_v48  ;;  %v5856_v31 = vsub.f32 %v2276_v18, %v5832_v62 }
 0x412   :  { %v2132_v44 = vmul.f32 %v4718_v7, %v2108_v28  ;;  %v5828_v16 = vpack.c.bf16 %v2294_v27, %v2290_v40  ;;  %v5830_v17 = vpack.c.bf16 %v2296_v57, %v2292_v48  ;;  %v2133_v49 = vmul.f32 %v4718_v7, %v2109_v11 }
 0x413   :  { %v2215_v26 = vadd.f32 %v5730_v34, %v2173_v30  ;;  %v2214_v2 = vadd.f32 %v5730_v34, %v2172_v1  ;;  %v5846_v25 = vsub.f32 %v2213_v32, %v2294_v27  ;;  %v5852_v60 = vsub.f32 %v2212_v38, %v2296_v57 }
 0x414   :  { %4308 = vmatprep.subr.bf16.mxu0 %v5828_v16  ;;  %v2174_v33 = vmul.f32 %v5728_v59, %v2132_v44  ;;  %v2175_v20 = vmul.f32 %v5728_v59, %v2133_v49  ;;  %v5859_v34 = vand.u32 4294901760, %v5837_v61  ;;  %v2110_v46 = vsub.f32 %v5640_v52, %v5771_v3 }
 0x415   :  { %4310 = vmatpush1.bf16.msra.mxu0 %v5830_v17  ;;  %v2111_v55 = vsub.f32 %v5642_v41, %v5771_v3  ;;  %v2112_v13 = vsub.f32 %v5644_v19, %v5775_v47  ;;  %v2113_v37 = vsub.f32 %v5646_v6, %v5775_v47  ;;  %v2298_v39 = vand.u32 4294901760, %v2215_v26  ;;  %v4192_v41 = vld [vmem:[%s6462_s5 + $0x58] sm:$0x1f] }
 0x416   :  { %v2216_v21 = vadd.f32 %v5732_v5, %v2174_v33  ;;  %v2217_v59 = vadd.f32 %v5732_v5, %v2175_v20  ;;  %v2300_v23 = vand.u32 4294901760, %v2214_v2  ;;  %v2435_v0 = vand.u32 4294901760, %v5844_v12  ;;  %v2208_v20 = vpop.permute.xlu0 %2207 }
 0x417   :  { %v2447_v52 = vand.u32 4294901760, %v5846_v25  ;;  %v2441_v63 = vand.u32 4294901760, %v5849_v43  ;;  %v2453_v6 = vand.u32 4294901760, %v5852_v60  ;;  %v5885_v57 = vsub.f32 %v2215_v26, %v2298_v39 }
 0x418   :  { %v2304_v28 = vand.u32 4294901760, %v2216_v21  ;;  %v2302_v18 = vand.u32 4294901760, %v2217_v59  ;;  %v5888_v1 = vsel %vm1131_vm3, %v4192_v41, 0  ;;  %v4331_v53 = vpack.c.bf16 %v5846_v25, %v5844_v12 }
 0x419   :  { %v4720_v4 = vpop.eup %4719  ;;  %v2448_v44 = vsub.f32 %v5846_v25, %v2447_v52  ;;  %v4333_v25 = vpack.c.bf16 %v5852_v60, %v5849_v43 }
 0x41a   :  { %v4722_v19 = vpop.eup %4721  ;;  %v2134_v5 = vmul.f32 %v4720_v4, %v2110_v46  ;;  %v2135_v3 = vmul.f32 %v4720_v4, %v2111_v55  ;;  %v5876_v32 = vpack.c.bf16 %v2304_v28, %v2300_v23  ;;  %v5879_v40 = vpack.c.bf16 %v2302_v18, %v2298_v39 }
 0x41b   :  { %v2136_v47 = vmul.f32 %v4722_v19, %v2112_v13  ;;  %v2137_v38 = vmul.f32 %v4722_v19, %v2113_v37  ;;  %v5881_v48 = vsub.f32 %v2217_v59, %v2302_v18  ;;  %v5893_v30 = vsub.f32 %v2216_v21, %v2304_v28 }
 0x41c   :  { %v2176_v14 = vmul.f32 %v5736_v45, %v2134_v5  ;;  %v2177_v27 = vmul.f32 %v5736_v45, %v2135_v3  ;;  %4312 = vmatprep.subr.bf16.mxu0 %v5879_v40  ;;  %v2436_v45 = vsub.f32 %v5844_v12, %v2435_v0  ;;  %v2442_v13 = vsub.f32 %v5849_v43, %v2441_v63 }
 0x41d   :  { %v2178_v7 = vmul.f32 %v5734_v36, %v2136_v47  ;;  %v2179_v11 = vmul.f32 %v5734_v36, %v2137_v38  ;;  %4314 = vmatpush1.bf16.msra.mxu0 %v5876_v32  ;;  %v2471_v26 = vand.u32 4294901760, %v5881_v48  ;;  %v2454_v36 = vsub.f32 %v5852_v60, %v2453_v6 }
 0x41e   :  { %v2218_v49 = vadd.f32 %v2203_v42, %v2176_v14  ;;  %v2219_v33 = vadd.f32 %v2203_v42, %v2177_v27  ;;  %v5901_v37 = vsub.f32 %v2214_v2, %v2300_v23  ;;  %v2459_v39 = vand.u32 4294901760, %v5885_v57 }
 0x41f   :  { %v2220_v46 = vadd.f32 %v2208_v20, %v2178_v7  ;;  %v2221_v55 = vadd.f32 %v2208_v20, %v2179_v11  ;;  %v2449_v18 = vand.u32 4294901760, %v2448_v44  ;;  %v2477_v41 = vand.u32 4294901760, %v5893_v30 }
 0x420   :  { %v2306_v59 = vand.u32 4294901760, %v2219_v33  ;;  %v2308_v21 = vand.u32 4294901760, %v2218_v49  ;;  %v2472_v47 = vsub.f32 %v5881_v48, %v2471_v26  ;;  %v2437_v14 = vand.u32 4294901760, %v2436_v45 }
 0x421   :  { %v2285_v28 = vsel %vm900_vm2, %v2220_v46, 0  ;;  %v2288_v4 = vsel %vm900_vm2, %v2221_v55, 0  ;;  %v2455_v2 = vand.u32 4294901760, %v2454_v36  ;;  %v5912_v23 = vpack.c.bf16 %v2447_v52, %v2435_v0 }
 0x422   :  { %v5907_v19 = vsub.f32 %v2219_v33, %v2306_v59  ;;  %v2310_v5 = vand.u32 4294901760, %v2288_v4  ;;  %v2312_v3 = vand.u32 4294901760, %v2285_v28  ;;  %v5910_v38 = vsub.f32 %v2218_v49, %v2308_v21 }
 0x423   :  { %v2460_v7 = vsub.f32 %v5885_v57, %v2459_v39  ;;  %v2465_v11 = vand.u32 4294901760, %v5901_v37  ;;  %v5925_v49 = vpack.c.bf16 %v2453_v6, %v2441_v63  ;;  %v4319_v45 = vpack.c.bf16 %v2449_v18, %v2437_v14 }
 0x424   :  { %v5914_v27 = vpack.c.bf16 %v2312_v3, %v2308_v21  ;;  %v5916_v42 = vsub.f32 %v2288_v4, %v2310_v5  ;;  %v2483_v44 = vand.u32 4294901760, %v5907_v19  ;;  %v5921_v33 = vsub.f32 %v2285_v28, %v2312_v3 }
 0x425   :  { %v5923_v20 = vpack.c.bf16 %v2310_v5, %v2306_v59  ;;  %v2473_v46 = vand.u32 4294901760, %v2472_v47  ;;  %v2478_v0 = vsub.f32 %v5893_v30, %v2477_v41  ;;  %v2489_v55 = vand.u32 4294901760, %v5910_v38 }
 0x426   :  { %v2495_v52 = vand.u32 4294901760, %v5916_v42  ;;  %v2501_v36 = vand.u32 4294901760, %v5921_v33  ;;  %v5932_v21 = vpack.c.bf16 %v2471_v26, %v2459_v39  ;;  %v5934_v28 = vpack.c.bf16 %v2477_v41, %v2465_v11 }
 0x427   :  { %4316 = vmatprep.subr.bf16.mxu0 %v5923_v20  ;;  %v2443_v63 = vand.u32 4294901760, %v2442_v13  ;;  %v2466_v6 = vsub.f32 %v5901_v37, %v2465_v11  ;;  %v2461_v18 = vand.u32 4294901760, %v2460_v7  ;;  %v2484_v5 = vsub.f32 %v5907_v19, %v2483_v44 }
 0x428   :  { %4318 = vmatpush1.bf16.msra.mxu0 %v5914_v27  ;;  %v2496_v59 = vsub.f32 %v5916_v42, %v2495_v52  ;;  %v5939_v4 = vpack.c.bf16 %v2495_v52, %v2483_v44  ;;  %v2392_v26 = vsub.f32 %v5808_v51, %v2391_v56  ;;  %v5945_v39 = vpack.c.bf16 %v2501_v36, %v2489_v55 }
 0x429   :  { %4320 = vmatprep.subr.bf16.mxu0 %v4319_v45  ;;  %v2502_v41 = vsub.f32 %v5921_v33, %v2501_v36  ;;  %v4321_v3 = vpack.c.bf16 %v2455_v2, %v2443_v63  ;;  %v2479_v13 = vand.u32 4294901760, %v2478_v0  ;;  %v2402_v47 = vand.u32 4294901760, %v5856_v31 }
 0x42a   :  { %v4323_v14 = vpack.c.bf16 %v2473_v46, %v2461_v18  ;;  %v2497_v11 = vand.u32 4294901760, %v2496_v59  ;;  %v5953_v7 = vsub.f32 %v5837_v61, %v5859_v34  ;;  %v5956_v44 = vand.u32 4294901760, %v5888_v1 }
 0x42b   :  { %2372 = vmatmul.mubr.f32.vlgmr.msra.gmra.mrb[12].mxu0 %v2371_v50  ;;  %v2490_v45 = vsub.f32 %v5910_v38, %v2489_v55  ;;  %v2467_v2 = vand.u32 4294901760, %v2466_v6  ;;  %v2485_v0 = vand.u32 4294901760, %v2484_v5  ;;  %v2393_v29 = vand.u32 4294901760, %v2392_v26 }
 0x42c   :  { %4322 = vmatpush1.bf16.msra.mxu0 %v4321_v3  ;;  %2377 = vmatprep.mubr.f32.mxu0 %v4763_v8  ;;  %v2503_v50 = vand.u32 4294901760, %v2502_v41  ;;  %v2403_v61 = vsub.f32 %v5856_v31, %v2402_v47  ;;  %v2413_v36 = vand.u32 4294901760, %v5953_v7  ;;  %v5968_v55 = vsub.f32 %v5888_v1, %v5956_v44 }
 0x42d   :  { %4324 = vmatprep.subr.bf16.mxu0 %v4323_v14  ;;  %v4325_v52 = vpack.c.bf16 %v2479_v13, %v2467_v2  ;;  %v4327_v46 = vpack.c.bf16 %v2497_v11, %v2485_v0  ;;  %v2491_v63 = vand.u32 4294901760, %v2490_v45  ;;  %v4335_v26 = vpack.c.bf16 %v5881_v48, %v5885_v57 }
 0x42e   :  { %v2414_v59 = vsub.f32 %v5953_v7, %v2413_v36  ;;  %v2424_v18 = vand.u32 4294901760, %v5968_v55  ;;  %v4337_v41 = vpack.c.bf16 %v5893_v30, %v5901_v37  ;;  %v4339_v3 = vpack.c.bf16 %v5916_v42, %v5907_v19 }
 0x42f   :  { %2383 = vmatmul.mubr.f32.gmra.mrb[14].mxu0 %v2382_v58  ;;  %v4329_v6 = vpack.c.bf16 %v2503_v50, %v2491_v63  ;;  %v2404_v58 = vand.u32 4294901760, %v2403_v61  ;;  %v4341_v43 = vpack.c.bf16 %v5921_v33, %v5910_v38 }
 0x430   :  { %4326 = vmatpush1.bf16.msra.mxu0 %v4325_v52  ;;  %2388 = vmatprep.mubr.f32.mxu0 %v4763_v8  ;;  %v2415_v1 = vand.u32 4294901760, %v2414_v59  ;;  %v2425_v5 = vsub.f32 %v5968_v55, %v2424_v18 }
 0x431   :  { %4328 = vmatprep.subr.bf16.mxu0 %v4327_v46 }
 0x432   :  { %v2426_v12 = vand.u32 4294901760, %v2425_v5 }
 0x433   :  { %2394 = vmatmul.mubr.f32.gmra.mrb[16].mxu0 %v2393_v29 }
 0x434   :  { %4330 = vmatpush1.bf16.msra.mxu0 %v4329_v6  ;;  %2399 = vmatprep.mubr.f32.mxu0 %v4763_v8 }
 0x435   :  { %4332 = vmatprep.subr.bf16.mxu0 %v4331_v53 }
 0x437   :  { %2405 = vmatmul.mubr.f32.gmra.mrb[18].mxu0 %v2404_v58 }
 0x438   :  { %2410 = vmatprep.mubr.f32.mxu0 %v4763_v8 }
 0x43b   :  { %2416 = vmatmul.mubr.f32.gmra.mrb[20].mxu0 %v2415_v1 }
 0x43c   :  { %2421 = vmatprep.mubr.f32.mxu0 %v4763_v8 }
 0x43f   :  { %2427 = vmatmul.mubr.f32.gmra.mrb[22].mxu0 %v2426_v12 }
 0x440   :  { %2557 = vmatprep.mubr.f32.mxu0 %v4763_v8 }
 0x443   :  { %2559 = vmatmul.mubr.f32.vlgmr.msra.gmra.mrb[12].mxu0 %v5756_v15 }
 0x444   :  { %4334 = vmatpush1.bf16.msra.mxu0 %v4333_v25  ;;  %2564 = vmatprep.mubr.f32.mxu0 %v4763_v8 }
 0x445   :  { %4336 = vmatprep.subr.bf16.mxu0 %v4335_v26 }
 0x447   :  { %2566 = vmatmul.mubr.f32.gmra.mrb[14].mxu0 %v5758_v54 }
 0x448   :  { %4338 = vmatpush1.bf16.msra.mxu0 %v4337_v41  ;;  %2571 = vmatprep.mubr.f32.mxu0 %v4763_v8 }
 0x449   :  { %4340 = vmatprep.subr.bf16.mxu0 %v4339_v3 }
 0x44b   :  { %2573 = vmatmul.mubr.f32.gmra.mrb[16].mxu0 %v5782_v9 }
 0x44c   :  { %4342 = vmatpush1.bf16.msra.mxu0 %v4341_v43  ;;  %2578 = vmatprep.mubr.f32.mxu0 %v4763_v8 }
 0x44d   :  { %4344 = vmatprep.subr.bf16.mxu0 %v5828_v16 }
 0x44f   :  { %2580 = vmatmul.mubr.f32.gmra.mrb[18].mxu0 %v5832_v62 }
 0x450   :  { %2585 = vmatprep.mubr.f32.mxu0 %v4763_v8 }
 0x453   :  { %2587 = vmatmul.mubr.f32.gmra.mrb[20].mxu0 %v5859_v34 }
 0x454   :  { %2592 = vmatprep.mubr.f32.mxu0 %v4763_v8 }
 0x457   :  { %2594 = vmatmul.mubr.f32.gmra.mrb[22].mxu0 %v5956_v44 }
 0x458   :  { %2688 = vmatprep.mubr.f32.mxu0 %v4763_v8 }
 0x45b   :  { %2691 = vmatmul.mubr.f32.vlgmr.msra.gmra.mrb[12].mxu0 %v5766_v35 }
 0x45c   :  { %4346 = vmatpush1.bf16.msra.mxu0 %v5830_v17  ;;  %2696 = vmatprep.mubr.f32.mxu0 %v4763_v8 }
 0x45d   :  { %4348 = vmatprep.subr.bf16.mxu0 %v5879_v40 }
 0x45f   :  { %2699 = vmatmul.mubr.f32.gmra.mrb[14].mxu0 %v5769_v22 }
 0x460   :  { %4350 = vmatpush1.bf16.msra.mxu0 %v5876_v32  ;;  %2704 = vmatprep.mubr.f32.mxu0 %v4763_v8 }
 0x461   :  { %4352 = vmatprep.subr.bf16.mxu0 %v5923_v20 }
 0x463   :  { %2707 = vmatmul.mubr.f32.gmra.mrb[16].mxu0 %v5808_v51 }
 0x464   :  { %4354 = vmatpush1.bf16.msra.mxu0 %v5914_v27  ;;  %2712 = vmatprep.mubr.f32.mxu0 %v4763_v8 }
 0x465   :  { %4356 = vmatprep.subr.bf16.mxu0 %v5912_v23 }
 0x467   :  { %2715 = vmatmul.mubr.f32.gmra.mrb[18].mxu0 %v5856_v31 }
 0x468   :  { %2720 = vmatprep.mubr.f32.mxu0 %v4763_v8 }
 0x46b   :  { %2723 = vmatmul.mubr.f32.gmra.mrb[20].mxu0 %v5953_v7 }
 0x46c   :  { %2728 = vmatprep.mubr.f32.mxu0 %v4763_v8 }
 0x46f   :  { %2731 = vmatmul.mubr.f32.gmra.mrb[22].mxu0 %v5968_v55 }
 0x470   :  { %2813 = vmatprep.mubr.f32.mxu0 %v4763_v8 }
 0x473   :  { %2817 = vmatmul.mubr.f32.vlgmr.msra.gmra.mrb[12].mxu0 %v2369_v24 }
 0x474   :  { %4358 = vmatpush1.bf16.msra.mxu0 %v5925_v49  ;;  %2822 = vmatprep.mubr.f32.mxu0 %v4763_v8 }
 0x475   :  { %4360 = vmatprep.subr.bf16.mxu0 %v5932_v21 }
 0x477   :  { %2826 = vmatmul.mubr.f32.gmra.mrb[14].mxu0 %v2380_v10 }
 0x478   :  { %4362 = vmatpush1.bf16.msra.mxu0 %v5934_v28  ;;  %2831 = vmatprep.mubr.f32.mxu0 %v4763_v8 }
 0x479   :  { %4364 = vmatprep.subr.bf16.mxu0 %v5939_v4 }
 0x47b   :  { %2835 = vmatmul.mubr.f32.gmra.mrb[16].mxu0 %v2391_v56 }
 0x47c   :  { %4366 = vmatpush1.bf16.msra.mxu0 %v5945_v39  ;;  %2840 = vmatprep.mubr.f32.mxu0 %v4763_v8 }
 0x47d   :  { %4368 = vmatprep.subr.bf16.mxu0 %v5828_v16 }
 0x47f   :  { %2844 = vmatmul.mubr.f32.gmra.mrb[18].mxu0 %v2402_v47 }
 0x480   :  { %2849 = vmatprep.mubr.f32.mxu0 %v4763_v8 }
 0x483   :  { %2853 = vmatmul.mubr.f32.gmra.mrb[20].mxu0 %v2413_v36 }
 0x484   :  { %2858 = vmatprep.mubr.f32.mxu0 %v4763_v8 }
 0x487   :  { %2862 = vmatmul.mubr.f32.gmra.mrb[22].mxu0 %v2424_v18 }
 0x488   :  { %2968 = vmatprep.mubr.f32.mxu0 %v4763_v8 }
 0x48b   :  { %2970 = vmatmul.mubr.f32.vlgmr.msra.gmra.mrb[12].mxu0 %v5756_v15 }
 0x48c   :  { %4370 = vmatpush1.bf16.msra.mxu0 %v5830_v17  ;;  %2975 = vmatprep.mubr.f32.mxu0 %v4763_v8 }
 0x48d   :  { %4372 = vmatprep.subr.bf16.mxu0 %v5879_v40 }
 0x48f   :  { %2977 = vmatmul.mubr.f32.gmra.mrb[14].mxu0 %v5758_v54 }
 0x490   :  { %4374 = vmatpush1.bf16.msra.mxu0 %v5876_v32  ;;  %2982 = vmatprep.mubr.f32.mxu0 %v4763_v8 }
 0x491   :  { %4376 = vmatprep.subr.bf16.mxu0 %v5923_v20 }
 0x493   :  { %2984 = vmatmul.mubr.f32.gmra.mrb[16].mxu0 %v5782_v9 }
 0x494   :  { %4378 = vmatpush1.bf16.msra.mxu0 %v5914_v27  ;;  %2989 = vmatprep.mubr.f32.mxu0 %v4763_v8 }
 0x497   :  { %2991 = vmatmul.mubr.f32.gmra.mrb[18].mxu0 %v5832_v62 }
 0x498   :  { %2996 = vmatprep.mubr.f32.mxu0 %v4763_v8 }
 0x49b   :  { %2998 = vmatmul.mubr.f32.gmra.mrb[20].mxu0 %v5859_v34 }
 0x49c   :  { %3003 = vmatprep.mubr.f32.mxu0 %v4763_v8 }
 0x49f   :  { %3005 = vmatmul.mubr.f32.gmra.mrb[22].mxu0 %v5956_v44 }
 0x4a0   :  { %3087 = vmatprep.mubr.f32.mxu0 %v4763_v8 }
 0x4a3   :  { %3089 = vmatmul.mubr.f32.vlgmr.msra.gmra.mrb[12].mxu0 %v5756_v15  ;;  %v2239_v15 = vpop.permute.xlu0 %2238 }
 0x4a4   :  { %3094 = vmatprep.mubr.f32.mxu0 %v4763_v8 }
 0x4a7   :  { %3096 = vmatmul.mubr.f32.gmra.mrb[14].mxu0 %v5758_v54  ;;  %v2249_v40 = vpop.permute.xlu0 %2248 }
 0x4a8   :  { %3101 = vmatprep.mubr.f32.mxu0 %v4763_v8 }
 0x4ab   :  { %3103 = vmatmul.mubr.f32.gmra.mrb[16].mxu0 %v5782_v9  ;;  %v2244_v9 = vpop.permute.xlu1 %2243  ;;  %v2264_v55 = vpop.permute.xlu0 %2263 }
 0x4ac   :  { %3108 = vmatprep.mubr.f32.mxu0 %v4763_v8 }
 0x4af   :  { %3110 = vmatmul.mubr.f32.gmra.mrb[18].mxu0 %v5832_v62  ;;  %v2254_v38 = vpop.permute.xlu1 %2253 }
 0x4b0   :  { %3115 = vmatprep.mubr.f32.mxu0 %v4763_v8 }
 0x4b3   :  { %3117 = vmatmul.mubr.f32.gmra.mrb[20].mxu0 %v5859_v34 }
 0x4b4   :  { %3122 = vmatprep.mubr.f32.mxu0 %v4763_v8 }
 0x4b7   :  { %3124 = vmatmul.mubr.f32.gmra.mrb[22].mxu0 %v5956_v44  ;;  %v2259_v44 = vpop.permute.xlu1 %2258 }
 0x576   :  { %v3090_v35 = vpop.f32.mrb[12].mxu0 }
 0x577   :  { %v4489_v22 = vadd.f32 %v3090_v35, %v2239_v15  ;;  %v3092_v54 = vpop.f32.mrb[13].mxu0 }
 0x578   :  { %v4490_v24 = vadd.f32 %v3092_v54, %v2239_v15 }
 0x579   :  { %v6077_v10 = vmax.f32 %v4489_v22, 0.0 }
 0x57a   :  { %v6079_v51 = vmax.f32 %v4490_v24, 0.0  ;;  %v3097_v16 = vpop.f32.mrb[14].mxu0 }
 0x57b   :  { %v4491_v17 = vadd.f32 %v3097_v16, %v2244_v9  ;;  %v3099_v62 = vpop.f32.mrb[15].mxu0  ;;  %v3182_v56 = vmul.f32 %v6077_v10, %v6077_v10 }
 0x57c   :  { %v4492_v60 = vadd.f32 %v3099_v62, %v2244_v9  ;;  %v3156_v31 = vadd.f32 %v6079_v51, %v6077_v10  ;;  %v3183_v34 = vmul.f32 %v6079_v51, %v6079_v51  ;;  %v4210_v62 = vld [vmem:[%s6465_s8 + $0x58] sm:$0x1f] }
 0x57d   :  { %v6087_v32 = vmax.f32 %v4491_v17, 0.0  ;;  %v4209_v17 = vld [vmem:[%s6465_s8 + $0x50] sm:$0xff] }
 0x57e   :  { %v6089_v48 = vmax.f32 %v4492_v60, 0.0  ;;  %v3104_v57 = vpop.f32.mrb[16].mxu0  ;;  %3157 = vadd.xlane.f32.xlu0 %v3156_v31  ;;  %v3194_v19 = vadd.f32 %v3183_v34, %v3182_v56  ;;  %v3360_v56 = vld [vmem:[%s6467_s10] sm:$0xff]  ;;  %v3361_v60 = vld [vmem:[%s6467_s10 + $0x8] sm:$0x7f]  ;;  %v6156_v34 = vpop.permute.xlu1 %3276 }
 0x57f   :  { %v4493_v30 = vadd.f32 %v3104_v57, %v2249_v40  ;;  %v3106_v37 = vpop.f32.mrb[17].mxu0  ;;  %v3184_v42 = vmul.f32 %v6087_v32, %v6087_v32  ;;  %v4033_v31 = vld [vmem:[%s6468_s11 + $0x8] sm:$0x7f]  ;;  %v6160_v57 = vpop.permute.xlu0 %3281 }
 0x580   :  { %v4494_v23 = vadd.f32 %v3106_v37, %v2249_v40  ;;  %v3159_v27 = vadd.f32 %v6089_v48, %v6087_v32  ;;  %v3185_v33 = vmul.f32 %v6089_v48, %v6089_v48 }
 0x581   :  { %v6097_v20 = vmax.f32 %v4493_v30, 0.0 }
 0x582   :  { %v6099_v49 = vmax.f32 %v4494_v23, 0.0  ;;  %v3111_v21 = vpop.f32.mrb[18].mxu0  ;;  %3160 = vadd.xlane.f32.xlu1 %v3159_v27  ;;  %3195 = vadd.xlane.f32.xlu0 %v3194_v19  ;;  %v3197_v47 = vadd.f32 %v3185_v33, %v3184_v42  ;;  %v6158_v40 = vpop.permute.xlu1 %3318 }
 0x583   :  { %v4495_v28 = vadd.f32 %v3111_v21, %v2254_v38  ;;  %v3113_v4 = vpop.f32.mrb[19].mxu0  ;;  %v3186_v39 = vmul.f32 %v6097_v20, %v6097_v20  ;;  %v6164_v37 = vpop.permute.xlu0 %3286 }
 0x584   :  { %v4496_v13 = vadd.f32 %v3113_v4, %v2254_v38  ;;  %v3162_v14 = vadd.f32 %v6099_v49, %v6097_v20  ;;  %v3187_v11 = vmul.f32 %v6099_v49, %v6099_v49 }
 0x585   :  { %v6107_v7 = vmax.f32 %v4495_v28, 0.0 }
 0x586   :  { %v6109_v45 = vmax.f32 %v4496_v13, 0.0  ;;  %v3118_v2 = vpop.f32.mrb[20].mxu0  ;;  %3198 = vadd.xlane.f32.xlu0 %v3197_v47  ;;  %3163 = vadd.xlane.f32.xlu1 %v3162_v14  ;;  %v3200_v29 = vadd.f32 %v3187_v11, %v3186_v39  ;;  %v6162_v30 = vpop.permute.xlu1 %3323 }
 0x587   :  { %v4497_v0 = vadd.f32 %v3118_v2, %v2259_v44  ;;  %v3120_v52 = vpop.f32.mrb[21].mxu0  ;;  %v3188_v61 = vmul.f32 %v6107_v7, %v6107_v7  ;;  %v6168_v38 = vpop.permute.xlu0 %3328 }
 0x588   :  { %v4498_v50 = vadd.f32 %v3120_v52, %v2259_v44  ;;  %v3165_v46 = vadd.f32 %v6109_v45, %v6107_v7  ;;  %v3189_v36 = vmul.f32 %v6109_v45, %v6109_v45 }
 0x589   :  { %v6117_v6 = vmax.f32 %v4497_v0, 0.0 }
 0x58a   :  { %v3125_v63 = vpop.f32.mrb[22].mxu0  ;;  %3166 = vadd.xlane.f32.xlu0 %v3165_v46  ;;  %3201 = vadd.xlane.f32.xlu1 %v3200_v29  ;;  %v6119_v59 = vmax.f32 %v4498_v50, 0.0  ;;  %v3203_v1 = vadd.f32 %v3189_v36, %v3188_v61  ;;  %v6166_v19 = vpop.permute.xlu1 %3291 }
 0x58b   :  { %v4499_v53 = vadd.f32 %v3125_v63, %v2264_v55  ;;  %v3127_v58 = vpop.f32.mrb[23].mxu0  ;;  %v3190_v26 = vmul.f32 %v6117_v6, %v6117_v6  ;;  %v6172_v27 = vpop.permute.xlu0 %3301 }
 0x58c   :  { %v4500_v18 = vadd.f32 %v3127_v58, %v2264_v55  ;;  %v3168_v3 = vadd.f32 %v6119_v59, %v6117_v6  ;;  %v3191_v15 = vmul.f32 %v6119_v59, %v6119_v59 }
 0x58d   :  { %v6121_v5 = vmax.f32 %v4499_v53, 0.0 }
 0x58e   :  { %v6123_v12 = vmax.f32 %v4500_v18, 0.0  ;;  %3204 = vadd.xlane.f32.xlu0 %v3203_v1  ;;  %v3206_v9 = vadd.f32 %v3191_v15, %v3190_v26  ;;  %v6170_v23 = vpop.permute.xlu1 %3333 }
 0x58f   :  { %v3171_v25 = vsel %vm900_vm2, %v6121_v5, 0.0  ;;  %v3192_v41 = vmul.f32 %v6121_v5, %v6121_v5 }
 0x590   :  { %v3172_v43 = vsel %vm900_vm2, %v6123_v12, 0.0  ;;  %v3193_v35 = vmul.f32 %v6123_v12, %v6123_v12 }
 0x591   :  { %v3173_v22 = vadd.f32 %v3172_v43, %v3171_v25  ;;  %v3209_v54 = vsel %vm900_vm2, %v3192_v41, 0.0 }
 0x592   :  { %3169 = vadd.xlane.f32.xlu0 %v3168_v3  ;;  %v3210_v24 = vsel %vm900_vm2, %v3193_v35, 0.0  ;;  %v6174_v42 = vpop.permute.xlu1 %3296 }
 0x593   :  { %3174 = vadd.xlane.f32.xlu1 %v3173_v22  ;;  %v3211_v16 = vadd.f32 %v3210_v24, %v3209_v54 }
 0x596   :  { %3207 = vadd.xlane.f32.xlu0 %v3206_v9  ;;  %v3358_v9 = vld [vmem:[%s6466_s9] sm:$0xff] }
 0x597   :  { %3212 = vadd.xlane.f32.xlu1 %v3211_v16 }
 0x5a8   :  { %3338 = vperm.xlu1 %4698, %v4209_v17  }
 0x5ac   :  { %3343 = vperm.xlu0 %4697, %v4210_v62   ;;  %3364 = vperm.xlu1 %4698, %v3360_v56  }
 0x5b0   :  { %3369 = vperm.xlu0 %4697, %v3361_v60   ;;  %4085 = vperm.xlu1 %4698, %v4033_v31  }
 0x60b   :  { %v3158_v33 = vpop.xlane.xlu0 %3157 }
 0x60c   :  { %v3176_v21 = vmul.f32 0.00390625, %v3158_v33 }
 0x60e   :  { %v3220_v13 = vmul.f32 %v3176_v21, %v3176_v21  ;;  %v3238_v16 = vsub.f32 %v6077_v10, %v3176_v21  ;;  %v3239_v56 = vsub.f32 %v6079_v51, %v3176_v21 }
 0x60f   :  { %v3161_v28 = vpop.xlane.xlu1 %3160  ;;  %v3196_v4 = vpop.xlane.xlu0 %3195 }
 0x610   :  { %v3177_v39 = vmul.f32 0.00390625, %v3161_v28  ;;  %v3214_v47 = vmul.f32 0.00390625, %v3196_v4  ;;  %v3373_v4 = vsel %vm1131_vm3, %v3358_v9, 0 }
 0x612   :  { %v3226_v14 = vsub.f32 %v3214_v47, %v3220_v13  ;;  %v3221_v52 = vmul.f32 %v3177_v39, %v3177_v39  ;;  %v3240_v31 = vsub.f32 %v6087_v32, %v3177_v39  ;;  %v3241_v10 = vsub.f32 %v6089_v48, %v3177_v39 }
 0x613   :  { %v3164_v11 = vpop.xlane.xlu1 %3163  ;;  %v3199_v44 = vpop.xlane.xlu0 %3198 }
 0x614   :  { %v3232_v2 = vmax.f32 %v3226_v14, 0.0  ;;  %v6176_v0 = vmul.f32 0.00390625, %v3164_v11  ;;  %v3215_v29 = vmul.f32 0.00390625, %v3199_v44 }
 0x616   :  { %v3250_v50 = vadd.f32 1e-05, %v3232_v2  ;;  %v3227_v46 = vsub.f32 %v3215_v29, %v3221_v52  ;;  %v3222_v61 = vmul.f32 %v6176_v0, %v6176_v0  ;;  %v6202_v29 = vand.u32 4294901760, %v3373_v4 }
 0x617   :  { %v3202_v36 = vpop.xlane.xlu1 %3201  ;;  %v3167_v55 = vpop.xlane.xlu0 %3166  ;;  %v3242_v39 = vsub.f32 %v6097_v20, %v6176_v0 }
 0x618   :  { %4723 = vrsqrt.f32 %v3250_v50  ;;  %v3233_v63 = vmax.f32 %v3227_v46, 0.0  ;;  %v3216_v53 = vmul.f32 0.00390625, %v3202_v36  ;;  %v6180_v58 = vmul.f32 0.00390625, %v3167_v55 }
 0x61a   :  { %v3251_v18 = vadd.f32 1e-05, %v3233_v63  ;;  %v3228_v1 = vsub.f32 %v3216_v53, %v3222_v61  ;;  %v3223_v41 = vmul.f32 %v6180_v58, %v6180_v58  ;;  %v3245_v9 = vsub.f32 %v6109_v45, %v6180_v58 }
 0x61b   :  { %v3205_v25 = vpop.xlane.xlu0 %3204 }
 0x61c   :  { %4725 = vrsqrt.f32 %v3251_v18  ;;  %v3234_v26 = vmax.f32 %v3228_v1, 0.0  ;;  %v3217_v3 = vmul.f32 0.00390625, %v3205_v25  ;;  %v3244_v25 = vsub.f32 %v6107_v7, %v6180_v58  ;;  %v3359_v7 = vld [vmem:[%s6466_s9 + $0x8] sm:$0x7f] }
 0x61e   :  { %v3252_v43 = vadd.f32 1e-05, %v3234_v26  ;;  %v3229_v15 = vsub.f32 %v3217_v3, %v3223_v41  ;;  %v6215_v41 = vsub.f32 %v3373_v4, %v6202_v29 }
 0x61f   :  { %v3170_v35 = vpop.xlane.xlu0 %3169 }
 0x620   :  { %4727 = vrsqrt.f32 %v3252_v43  ;;  %v3235_v22 = vmax.f32 %v3229_v15, 0.0  ;;  %v6184_v54 = vmul.f32 0.00390625, %v3170_v35  ;;  %v3175_v24 = vpop.xlane.xlu1 %3174 }
 0x621   :  { %v6190_v17 = vmul.f32 0.00390625, %v3175_v24 }
 0x622   :  { %v4724_v62 = vpop.eup %4723  ;;  %v3253_v60 = vadd.f32 1e-05, %v3235_v22  ;;  %v3224_v13 = vmul.f32 %v6184_v54, %v6184_v54 }
 0x623   :  { %v3262_v33 = vmul.f32 %v4724_v62, %v3238_v16  ;;  %v3208_v28 = vpop.xlane.xlu0 %3207  ;;  %v3263_v11 = vmul.f32 %v4724_v62, %v3239_v56  ;;  %v3225_v44 = vmul.f32 %v6190_v17, %v6190_v17 }
 0x624   :  { %4729 = vrsqrt.f32 %v3253_v60  ;;  %v3218_v47 = vmul.f32 0.00390625, %v3208_v28  ;;  %v3213_v14 = vpop.xlane.xlu1 %3212  ;;  %v3463_v60 = vand.u32 4294901760, %v6215_v41 }
 0x625   :  { %v3219_v51 = vmul.f32 0.00390625, %v3213_v14  ;;  %v3304_v21 = vmul.f32 %v6156_v34, %v3262_v33  ;;  %v3305_v52 = vmul.f32 %v6156_v34, %v3263_v11  ;;  %v3243_v34 = vsub.f32 %v6099_v49, %v6176_v0 }
 0x626   :  { %v4726_v32 = vpop.eup %4725  ;;  %v3230_v2 = vsub.f32 %v3218_v47, %v3224_v13  ;;  %v3376_v33 = vsel %vm1131_vm3, %v3359_v7, 0  ;;  %v6246_v14 = vsub.f32 %v6215_v41, %v3463_v60 }
 0x627   :  { %v3264_v50 = vmul.f32 %v4726_v32, %v3240_v31  ;;  %v3231_v46 = vsub.f32 %v3219_v51, %v3225_v44  ;;  %v3265_v61 = vmul.f32 %v4726_v32, %v3241_v10  ;;  %v3347_v55 = vadd.f32 %v6158_v40, %v3305_v52 }
 0x628   :  { %v3236_v36 = vmax.f32 %v3230_v2, 0.0  ;;  %v3346_v48 = vadd.f32 %v6158_v40, %v3304_v21  ;;  %v6248_v11 = vand.u32 4294901760, %v3376_v33  ;;  %v3246_v10 = vsub.f32 %v6117_v6, %v6184_v54 }
 0x629   :  { %v3237_v63 = vmax.f32 %v3231_v46, 0.0  ;;  %v3307_v53 = vmul.f32 %v6160_v57, %v3265_v61  ;;  %v3306_v18 = vmul.f32 %v6160_v57, %v3264_v50  ;;  %v3384_v15 = vand.u32 4294901760, %v3347_v55 }
 0x62a   :  { %v4728_v1 = vpop.eup %4727  ;;  %v3254_v26 = vadd.f32 1e-05, %v3236_v36  ;;  %v3386_v57 = vand.u32 4294901760, %v3346_v48  ;;  %v3247_v44 = vsub.f32 %v6119_v59, %v6184_v54  ;;  %v3249_v51 = vsub.f32 %v6123_v12, %v6190_v17 }
 0x62b   :  { %v3266_v40 = vmul.f32 %v4728_v1, %v3242_v39  ;;  %v3255_v3 = vadd.f32 1e-05, %v3237_v63  ;;  %v3349_v20 = vadd.f32 %v6162_v30, %v3307_v53  ;;  %v3348_v43 = vadd.f32 %v6162_v30, %v3306_v18 }
 0x62c   :  { %4731 = vrsqrt.f32 %v3254_v26  ;;  %v3267_v35 = vmul.f32 %v4728_v1, %v3243_v34  ;;  %v6235_v13 = vsub.f32 %v3347_v55, %v3384_v15  ;;  %v6259_v21 = vsub.f32 %v3346_v48, %v3386_v57  ;;  %v3339_v1 = vpop.permute.xlu1 %3338 }
 0x62d   :  { %4733 = vrsqrt.f32 %v3255_v3  ;;  %v3388_v22 = vand.u32 4294901760, %v3349_v20  ;;  %v3390_v49 = vand.u32 4294901760, %v3348_v43  ;;  %v3308_v0 = vmul.f32 %v6164_v37, %v3266_v40 }
 0x62e   :  { %v4730_v24 = vpop.eup %4729  ;;  %v3309_v16 = vmul.f32 %v6164_v37, %v3267_v35  ;;  %v3485_v61 = vand.u32 4294901760, %v6235_v13  ;;  %v3491_v53 = vand.u32 4294901760, %v6259_v21  ;;  %v6275_v18 = vsub.f32 %v3376_v33, %v6248_v11 }
 0x62f   :  { %v3268_v30 = vmul.f32 %v4730_v24, %v3244_v25  ;;  %v6226_v62 = vpack.c.bf16 %v3388_v22, %v3384_v15  ;;  %v6228_v56 = vpack.c.bf16 %v3390_v49, %v3386_v57  ;;  %v3269_v31 = vmul.f32 %v4730_v24, %v3245_v9 }
 0x630   :  { %v3350_v4 = vadd.f32 %v6168_v38, %v3308_v0  ;;  %v3351_v37 = vadd.f32 %v6168_v38, %v3309_v16  ;;  %v6240_v58 = vsub.f32 %v3349_v20, %v3388_v22  ;;  %v6261_v50 = vsub.f32 %v3348_v43, %v3390_v49  ;;  %v3344_v43 = vpop.permute.xlu0 %3343 }
 0x631   :  { %4380 = vmatprep.subr.bf16.mxu1 %v6226_v62  ;;  %v3310_v28 = vmul.f32 %v6166_v19, %v3268_v30  ;;  %v3311_v45 = vmul.f32 %v6166_v19, %v3269_v31  ;;  %v3248_v19 = vsub.f32 %v6121_v5, %v6190_v17  ;;  %v3486_v15 = vsub.f32 %v6235_v13, %v3485_v61 }
 0x632   :  { %4382 = vmatpush1.bf16.msra.mxu1 %v6228_v56  ;;  %v3394_v32 = vand.u32 4294901760, %v3350_v4  ;;  %v3392_v46 = vand.u32 4294901760, %v3351_v37  ;;  %v3503_v40 = vand.u32 4294901760, %v6261_v50  ;;  %v3474_v24 = vand.u32 4294901760, %v6275_v18 }
 0x633   :  { %v3352_v47 = vadd.f32 %v6170_v23, %v3310_v28  ;;  %v3353_v38 = vadd.f32 %v6170_v23, %v3311_v45  ;;  %v3497_v23 = vand.u32 4294901760, %v6240_v58 }
 0x634   :  { %v6280_v26 = vsub.f32 %v3351_v37, %v3392_v46  ;;  %v6293_v7 = vsub.f32 %v3350_v4, %v3394_v32  ;;  %v3504_v30 = vsub.f32 %v6261_v50, %v3503_v40  ;;  %v3487_v4 = vand.u32 4294901760, %v3486_v15 }
 0x635   :  { %v3398_v2 = vand.u32 4294901760, %v3352_v47  ;;  %v3396_v6 = vand.u32 4294901760, %v3353_v38 }
 0x636   :  { %v4732_v52 = vpop.eup %4731  ;;  %v3509_v31 = vand.u32 4294901760, %v6280_v26 }
 0x637   :  { %v4734_v59 = vpop.eup %4733  ;;  %v3270_v54 = vmul.f32 %v4732_v52, %v3246_v10  ;;  %v3271_v36 = vmul.f32 %v4732_v52, %v3247_v44  ;;  %v6264_v5 = vpack.c.bf16 %v3398_v2, %v3394_v32  ;;  %v6267_v17 = vpack.c.bf16 %v3396_v6, %v3392_v46 }
 0x638   :  { %v3272_v55 = vmul.f32 %v4734_v59, %v3248_v19  ;;  %v3273_v12 = vmul.f32 %v4734_v59, %v3249_v51  ;;  %v6269_v48 = vsub.f32 %v3353_v38, %v3396_v6  ;;  %v3492_v10 = vsub.f32 %v6259_v21, %v3491_v53 }
 0x639   :  { %v3312_v39 = vmul.f32 %v6174_v42, %v3270_v54  ;;  %v3313_v63 = vmul.f32 %v6174_v42, %v3271_v36  ;;  %4384 = vmatprep.subr.bf16.mxu1 %v6267_v17  ;;  %v6284_v42 = vsub.f32 %v3352_v47, %v3398_v2  ;;  %v3515_v32 = vand.u32 4294901760, %v6293_v7 }
 0x63a   :  { %v3314_v34 = vmul.f32 %v6172_v27, %v3272_v55  ;;  %v3315_v25 = vmul.f32 %v6172_v27, %v3273_v12  ;;  %4386 = vmatpush1.bf16.msra.mxu1 %v6264_v5  ;;  %v3498_v27 = vsub.f32 %v6240_v58, %v3497_v23  ;;  %v3521_v22 = vand.u32 4294901760, %v6269_v48 }
 0x63b   :  { %v3354_v3 = vadd.f32 %v3339_v1, %v3312_v39  ;;  %v3355_v20 = vadd.f32 %v3339_v1, %v3313_v63  ;;  %v3527_v37 = vand.u32 4294901760, %v6284_v42  ;;  %v3510_v6 = vsub.f32 %v6280_v26, %v3509_v31 }
 0x63c   :  { %v3356_v57 = vadd.f32 %v3344_v43, %v3314_v34  ;;  %v3357_v35 = vadd.f32 %v3344_v43, %v3315_v25  ;;  %v3499_v47 = vand.u32 4294901760, %v3498_v27  ;;  %v3522_v44 = vsub.f32 %v6269_v48, %v3521_v22 }
 0x63d   :  { %v3400_v49 = vand.u32 4294901760, %v3355_v20  ;;  %v3402_v0 = vand.u32 4294901760, %v3354_v3  ;;  %v3465_v59 = vand.u32 4294901760, %v6246_v14  ;;  %v3505_v54 = vand.u32 4294901760, %v3504_v30 }
 0x63e   :  { %v3379_v9 = vsel %vm900_vm2, %v3356_v57, 0  ;;  %v3382_v16 = vsel %vm900_vm2, %v3357_v35, 0  ;;  %v3528_v36 = vsub.f32 %v6284_v42, %v3527_v37  ;;  %v4391_v39 = vpack.c.bf16 %v3499_v47, %v3487_v4 }
 0x63f   :  { %v6302_v33 = vsub.f32 %v3355_v20, %v3400_v49  ;;  %v3404_v28 = vand.u32 4294901760, %v3382_v16  ;;  %v3406_v45 = vand.u32 4294901760, %v3379_v9  ;;  %v6311_v19 = vsub.f32 %v3354_v3, %v3402_v0 }
 0x640   :  { %v3523_v63 = vand.u32 4294901760, %v3522_v44  ;;  %v3475_v1 = vsub.f32 %v6275_v18, %v3474_v24  ;;  %v3493_v14 = vand.u32 4294901760, %v3492_v10  ;;  %v3516_v25 = vsub.f32 %v6293_v7, %v3515_v32 }
 0x641   :  { %v6313_v38 = vpack.c.bf16 %v3406_v45, %v3402_v0  ;;  %v6315_v51 = vsub.f32 %v3382_v16, %v3404_v28  ;;  %v3533_v2 = vand.u32 4294901760, %v6302_v33  ;;  %v6319_v52 = vsub.f32 %v3379_v9, %v3406_v45 }
 0x642   :  { %v6321_v46 = vpack.c.bf16 %v3404_v28, %v3400_v49  ;;  %v3539_v34 = vand.u32 4294901760, %v6311_v19  ;;  %v3511_v20 = vand.u32 4294901760, %v3510_v6  ;;  %v4393_v57 = vpack.c.bf16 %v3505_v54, %v3493_v14 }
 0x643   :  { %v3545_v55 = vand.u32 4294901760, %v6315_v51  ;;  %v3551_v12 = vand.u32 4294901760, %v6319_v52  ;;  %v3534_v43 = vsub.f32 %v6302_v33, %v3533_v2  ;;  %v3529_v35 = vand.u32 4294901760, %v3528_v36 }
 0x644   :  { %4388 = vmatprep.subr.bf16.mxu1 %v6321_v46  ;;  %v4395_v27 = vpack.c.bf16 %v3523_v63, %v3511_v20  ;;  %v3476_v0 = vand.u32 4294901760, %v3475_v1  ;;  %v3540_v9 = vsub.f32 %v6311_v19, %v3539_v34  ;;  %v3517_v16 = vand.u32 4294901760, %v3516_v25 }
 0x645   :  { %4390 = vmatpush1.bf16.msra.mxu1 %v6313_v38  ;;  %v3546_v3 = vsub.f32 %v6315_v51, %v3545_v55  ;;  %v3552_v15 = vsub.f32 %v6319_v52, %v3551_v12  ;;  %v3535_v30 = vand.u32 4294901760, %v3534_v43  ;;  %v4403_v44 = vpack.c.bf16 %v6240_v58, %v6235_v13 }
 0x646   :  { %4392 = vmatprep.subr.bf16.mxu1 %v4391_v39  ;;  %v4397_v28 = vpack.c.bf16 %v3529_v35, %v3517_v16  ;;  %v3541_v47 = vand.u32 4294901760, %v3540_v9  ;;  %v4405_v6 = vpack.c.bf16 %v6261_v50, %v6259_v21  ;;  %v4409_v54 = vpack.c.bf16 %v6284_v42, %v6293_v7 }
 0x647   :  { %v3547_v49 = vand.u32 4294901760, %v3546_v3  ;;  %v3553_v45 = vand.u32 4294901760, %v3552_v15  ;;  %v4411_v36 = vpack.c.bf16 %v6315_v51, %v6302_v33  ;;  %v4413_v39 = vpack.c.bf16 %v6319_v52, %v6311_v19  ;;  %v4035_v51 = vld [vmem:[%s6469_s12 + $0x8] sm:$0x7f]  ;;  %v4032_v52 = vld [vmem:[%s6468_s11] sm:$0xff]  ;;  %s4766_s11 = smov [#allocation3]  }
 0x648   :  { %3466 = vmatmul.mubr.f32.vlgmr.msra.gmra.mrb[24].mxu1 %v3465_v59  ;;  %v4407_v59 = vpack.c.bf16 %v6269_v48, %v6280_v26  ;;  %v4427_v63 = vpack.c.bf16 %v3497_v23, %v3485_v61  ;;  %v4429_v1 = vpack.c.bf16 %v3503_v40, %v3491_v53  ;;  %v4431_v14 = vpack.c.bf16 %v3521_v22, %v3509_v31  ;;  %v3370_v23 = vpop.permute.xlu0 %3369 }
 0x649   :  { %4394 = vmatpush1.bf16.msra.mxu1 %v4393_v57  ;;  %3471 = vmatprep.mubr.f32.mxu1 %v4763_v8  ;;  %v4399_v4 = vpack.c.bf16 %v3547_v49, %v3535_v30  ;;  %v4401_v10 = vpack.c.bf16 %v3553_v45, %v3541_v47  ;;  %v4433_v13 = vpack.c.bf16 %v3527_v37, %v3515_v32  ;;  %v4034_v32 = vld [vmem:[%s6469_s12] sm:$0xff]  ;;  %s4179_s12 = sshll.u32 %s4766_s11, 4  ;;  %s4180_s12 = int_to_ptr.vmem [resolvable:$true] %s4179_s12 }
 0x64a   :  { %4396 = vmatprep.subr.bf16.mxu1 %v4395_v27  ;;  %p4744_p1 = scmp.lt.s32.totalorder %s4180_s12, %s4180_s12 }
 0x64c   :  { %3477 = vmatmul.mubr.f32.gmra.mrb[26].mxu1 %v3476_v0 }
 0x64d   :  { %4398 = vmatpush1.bf16.msra.mxu1 %v4397_v28  ;;  %3607 = vmatprep.mubr.f32.mxu1 %v4763_v8 }
 0x64e   :  { %4400 = vmatprep.subr.bf16.mxu1 %v4399_v4 }
 0x651   :  { %4402 = vmatpush1.bf16.msra.mxu1 %v4401_v10 }
 0x652   :  { %4404 = vmatprep.subr.bf16.mxu1 %v4403_v44 }
 0x654   :  { %3609 = vmatmul.mubr.f32.vlgmr.msra.gmra.mrb[24].mxu1 %v6202_v29 }
 0x655   :  { %4406 = vmatpush1.bf16.msra.mxu1 %v4405_v6  ;;  %3614 = vmatprep.mubr.f32.mxu1 %v4763_v8 }
 0x656   :  { %4408 = vmatprep.subr.bf16.mxu1 %v4407_v59 }
 0x658   :  { %3616 = vmatmul.mubr.f32.gmra.mrb[26].mxu1 %v6248_v11 }
 0x659   :  { %4410 = vmatpush1.bf16.msra.mxu1 %v4409_v54  ;;  %3710 = vmatprep.mubr.f32.mxu1 %v4763_v8 }
 0x65a   :  { %4412 = vmatprep.subr.bf16.mxu1 %v4411_v36 }
 0x65d   :  { %4414 = vmatpush1.bf16.msra.mxu1 %v4413_v39 }
 0x65e   :  { %4416 = vmatprep.subr.bf16.mxu1 %v6226_v62 }
 0x660   :  { %3713 = vmatmul.mubr.f32.vlgmr.msra.gmra.mrb[24].mxu1 %v6215_v41  ;;  %v4435_v41 = vpack.c.bf16 %v3545_v55, %v3533_v2  ;;  %v4106_v2 = vld [vmem:[%s6470_s13] sm:$0xff] }
 0x661   :  { %4418 = vmatpush1.bf16.msra.mxu1 %v6228_v56  ;;  %3718 = vmatprep.mubr.f32.mxu1 %v4763_v8  ;;  %v4138_v55 = vld [vmem:[#allocation2] sm:$0x1] }
 0x662   :  { %4420 = vmatprep.subr.bf16.mxu1 %v6267_v17 }
 0x664   :  { %3721 = vmatmul.mubr.f32.gmra.mrb[26].mxu1 %v6275_v18 }
 0x665   :  { %4422 = vmatpush1.bf16.msra.mxu1 %v6264_v5  ;;  %3803 = vmatprep.mubr.f32.mxu1 %v4763_v8 }
 0x666   :  { %4424 = vmatprep.subr.bf16.mxu1 %v6321_v46 }
 0x669   :  { %4426 = vmatpush1.bf16.msra.mxu1 %v6313_v38 }
 0x66a   :  { %4428 = vmatprep.subr.bf16.mxu1 %v4427_v63 }
 0x66c   :  { %3807 = vmatmul.mubr.f32.vlgmr.msra.gmra.mrb[24].mxu1 %v3463_v60  ;;  %v4437_v60 = vpack.c.bf16 %v3551_v12, %v3539_v34 }
 0x66d   :  { %4430 = vmatpush1.bf16.msra.mxu1 %v4429_v1  ;;  %3812 = vmatprep.mubr.f32.mxu1 %v4763_v8 }
 0x66e   :  { %4432 = vmatprep.subr.bf16.mxu1 %v4431_v14 }
 0x670   :  { %3816 = vmatmul.mubr.f32.gmra.mrb[26].mxu1 %v3474_v24 }
 0x671   :  { %4434 = vmatpush1.bf16.msra.mxu1 %v4433_v13  ;;  %3922 = vmatprep.mubr.f32.mxu1 %v4763_v8 }
 0x672   :  { %4436 = vmatprep.subr.bf16.mxu1 %v4435_v41 }
 0x675   :  { %4438 = vmatpush1.bf16.msra.mxu1 %v4437_v60 }
 0x676   :  { %4440 = vmatprep.subr.bf16.mxu1 %v6226_v62  ;;  %v3365_v62 = vpop.permute.xlu1 %3364 }
 0x678   :  { %3924 = vmatmul.mubr.f32.vlgmr.msra.gmra.mrb[24].mxu1 %v6202_v29 }
 0x679   :  { %4442 = vmatpush1.bf16.msra.mxu1 %v6228_v56  ;;  %3929 = vmatprep.mubr.f32.mxu1 %v4763_v8 }
 0x67a   :  { %4444 = vmatprep.subr.bf16.mxu1 %v6267_v17  ;;  %v4086_v12 = vpop.permute.xlu1 %4085 }
 0x67c   :  { %3931 = vmatmul.mubr.f32.gmra.mrb[26].mxu1 %v6248_v11 }
 0x67d   :  { %4446 = vmatpush1.bf16.msra.mxu1 %v6264_v5  ;;  %4013 = vmatprep.mubr.f32.mxu1 %v4763_v8 }
 0x67e   :  { %4448 = vmatprep.subr.bf16.mxu1 %v6321_v46  ;;  %v4107_v46 = vld [vmem:[%s6470_s13 + $0x8] sm:$0x7f]  ;;  %s4739_s13 = scalar_lea.vmem %s4180_s12, 32 }
 0x67f   :  { %p4740_p0 = scmp.ne.s32.totalorder %s4180_s12, %s4739_s13  ;;  %p4745_p2 = scmp.lt.s32.totalorder %s4739_s13, %s4739_s13 }
 0x681   :  { %4450 = vmatpush1.bf16.msra.mxu1 %v6313_v38  ;;  %p4746_p3 = por %p4745_p2, %p4744_p1 }
 0x683   :  { %p4747_p4 = pnand %p4746_p3, %p4740_p0 }
 0x684   :  { %4015 = vmatmul.mubr.f32.vlgmr.msra.gmra.mrb[24].mxu1 %v6202_v29 }
 0x685   :  { %4020 = vmatprep.mubr.f32.mxu1 %v4763_v8 }
 0x688   :  { %4022 = vmatmul.mubr.f32.gmra.mrb[26].mxu1 %v6248_v11 }
 0x757   :  { %v4016_v56 = vpop.f32.mrb[24].mxu1 }
 0x758   :  { %v4501_v58 = vadd.f32 %v4016_v56, %v3365_v62  ;;  %v4018_v21 = vpop.f32.mrb[25].mxu1 }
 0x759   :  { %v4502_v50 = vadd.f32 %v4018_v21, %v3365_v62 }
 0x75a   :  { %v4028_v61 = vmax.f32 %v4501_v58, 0.0 }
 0x75b   :  { %v4029_v5 = vmax.f32 %v4502_v50, 0.0  ;;  %v4023_v17 = vpop.f32.mrb[26].mxu1 }
 0x75c   :  { %v4503_v48 = vadd.f32 %v4023_v17, %v3370_v23  ;;  %v4025_v53 = vpop.f32.mrb[27].mxu1  ;;  %v4046_v18 = vmul.f32 %v4028_v61, %v4028_v61 }
 0x75d   :  { %v4504_v26 = vadd.f32 %v4025_v53, %v3370_v23  ;;  %v4036_v40 = vadd.f32 %v4029_v5, %v4028_v61  ;;  %v4047_v42 = vmul.f32 %v4029_v5, %v4029_v5 }
 0x75e   :  { %v4030_v29 = vmax.f32 %v4503_v48, 0.0 }
 0x75f   :  { %v4031_v22 = vmax.f32 %v4504_v26, 0.0  ;;  %4037 = vadd.xlane.f32.xlu1 %v4036_v40  ;;  %v4050_v8 = vadd.f32 %v4047_v42, %v4046_v18 }
 0x760   :  { %v4039_v11 = vsel %vm118_vm0, %v4030_v29, 0.0  ;;  %v4048_v7 = vmul.f32 %v4030_v29, %v4030_v29 }
 0x761   :  { %4051 = vadd.xlane.f32.xlu0 %v4050_v8  ;;  %v4040_v24 = vsel %vm118_vm0, %v4031_v22, 0.0  ;;  %v4049_v31 = vmul.f32 %v4031_v22, %v4031_v22 }
 0x762   :  { %v4041_v33 = vadd.f32 %v4040_v24, %v4039_v11  ;;  %v4053_v37 = vsel %vm118_vm0, %v4048_v7, 0.0 }
 0x763   :  { %v4054_v19 = vsel %vm118_vm0, %v4049_v31, 0.0 }
 0x764   :  { %v4055_v38 = vadd.f32 %v4054_v19, %v4053_v37  ;;  %v4765_v19 = vmov 1966171168  }
 0x765   :  { %4042 = vadd.xlane.f32.xlu0 %v4041_v33 }
 0x769   :  { %4056 = vadd.xlane.f32.xlu0 %v4055_v38  ;;  %v4154_v38 = vunpack.c.l.s4 %v4765_v19 }
 0x770   :  { %4099 = vperm.xlu1 %4698, %v4035_v51  }
 0x774   :  { %4094 = vperm.xlu1 %4698, %v4034_v32  }
 0x778   :  { %4110 = vperm.xlu1 %4698, %v4106_v2  }
 0x77f   :  { %4080 = vperm.xlu0 %4697, %v4032_v52  }
 0x783   :  { %4115 = vperm.xlu0 %4697, %v4107_v46  }
 0x787   :  { %4141 = vperm.xlu0 %4697, %v4138_v55  }
 0x7ec   :  { %v4038_v34 = vpop.xlane.xlu1 %4037 }
 0x7ed   :  { %v4044_v25 = vmul.f32 0.00390625, %v4038_v34 }
 0x7ee   :  { %v4052_v3 = vpop.xlane.xlu0 %4051 }
 0x7ef   :  { %v4060_v20 = vmul.f32 %v4044_v25, %v4044_v25  ;;  %v4058_v43 = vmul.f32 0.00390625, %v4052_v3  ;;  %v4066_v47 = vsub.f32 %v4028_v61, %v4044_v25  ;;  %v4067_v10 = vsub.f32 %v4029_v5, %v4044_v25 }
 0x7f0   :  { %v4100_v44 = vpop.permute.xlu1 %4099 }
 0x7f1   :  { %v4062_v15 = vsub.f32 %v4058_v43, %v4060_v20 }
 0x7f2   :  { %v4043_v57 = vpop.xlane.xlu0 %4042 }
 0x7f3   :  { %v4064_v35 = vmax.f32 %v4062_v15, 0.0  ;;  %v4045_v27 = vmul.f32 0.00390625, %v4043_v57 }
 0x7f4   :  { %v4095_v13 = vpop.permute.xlu1 %4094 }
 0x7f5   :  { %v4070_v49 = vadd.f32 1e-05, %v4064_v35  ;;  %v4061_v9 = vmul.f32 %v4045_v27, %v4045_v27  ;;  %v4068_v54 = vsub.f32 %v4030_v29, %v4045_v27  ;;  %v4069_v36 = vsub.f32 %v4031_v22, %v4045_v27 }
 0x7f6   :  { %v4057_v0 = vpop.xlane.xlu0 %4056  ;;  %v4144_v22 = vlaneseq }
 0x7f7   :  { %v4059_v16 = vmul.f32 0.00390625, %v4057_v0  ;;  %4735 = vrsqrt.f32 %v4070_v49 }
 0x7f8   :  { %v4111_v5 = vpop.permute.xlu1 %4110  ;;  %v4145_v31 = vshrl.u32 %v4144_v22, 7  ;;  %vm4170_vm4 = vcmp.lt.s32.totalorder %v4144_v22, 256 }
 0x7f9   :  { %v4063_v30 = vsub.f32 %v4059_v16, %v4061_v9 }
 0x7fa   :  { %v4146_v2 = vsub.s32 0, %v4145_v31 }
 0x7fb   :  { %v4065_v28 = vmax.f32 %v4063_v30, 0.0 }
 0x7fd   :  { %v4071_v45 = vadd.f32 1e-05, %v4065_v28 }
 0x7fe   :  { %v4081_v39 = vpop.permute.xlu0 %4080 }
 0x7ff   :  { %4737 = vrsqrt.f32 %v4071_v45 }
 0x801   :  { %v4736_v4 = vpop.eup %4735 }
 0x802   :  { %v4074_v6 = vmul.f32 %v4736_v4, %v4066_v47  ;;  %v4075_v59 = vmul.f32 %v4736_v4, %v4067_v10  ;;  %v4116_v61 = vpop.permute.xlu0 %4115 }
 0x804   :  { %v4088_v1 = vmul.f32 %v4081_v39, %v4074_v6  ;;  %v4089_v14 = vmul.f32 %v4081_v39, %v4075_v59 }
 0x806   :  { %v4102_v58 = vadd.f32 %v4095_v13, %v4088_v1  ;;  %v4103_v21 = vadd.f32 %v4095_v13, %v4089_v14  ;;  %v4142_v52 = vpop.permute.xlu0 %4141 }
 0x807   :  { %v4147_v3 = vrot.slane %v4142_v52, %v4146_v2 }
 0x808   :  { %v4118_v53 = vmul.f32 %v4111_v5, %v4102_v58  ;;  %v4119_v18 = vmul.f32 %v4111_v5, %v4103_v21 }
 0x809   :  { %v4738_v63 = vpop.eup %4737 }
 0x80a   :  { %v4076_v41 = vmul.f32 %v4738_v63, %v4068_v54  ;;  %v4077_v60 = vmul.f32 %v4738_v63, %v4069_v36 }
 0x80c   :  { %v4090_v62 = vmul.f32 %v4086_v12, %v4076_v41  ;;  %v4091_v56 = vmul.f32 %v4086_v12, %v4077_v60  ;;  %v4155_v12 = vunpack.c.0.s8 %v4154_v38 }
 0x80e   :  { %v4104_v50 = vadd.f32 %v4100_v44, %v4090_v62  ;;  %v4105_v23 = vadd.f32 %v4100_v44, %v4091_v56  ;;  %v4158_v15 = vsub.s32 %v4155_v12, %v4145_v31 }
 0x810   :  { %v4120_v17 = vmul.f32 %v4116_v61, %v4104_v50  ;;  %v4121_v48 = vmul.f32 %v4116_v61, %v4105_v23 }
 0x812   :  { %v4122_v26 = vsel %vm118_vm0, %v4120_v17, 0.0  ;;  %v4130_v40 = vsel %vm118_vm0, %v4121_v48, 0.0 }
 0x813   :  { %v4123_v42 = vadd.f32 %v4122_v26, %v4118_v53  ;;  %v4131_v29 = vadd.f32 %v4130_v40, %v4119_v18 }
 0x815   :  { %v4124_v8 = vrot.slane %v4123_v42, 4  ;;  %v4132_v11 = vrot.slane %v4131_v29, 4 }
 0x817   :  { %v4125_v7 = vadd.f32 %v4124_v8, %v4123_v42  ;;  %v4133_v24 = vadd.f32 %v4132_v11, %v4131_v29 }
 0x819   :  { %v4126_v33 = vrot.slane %v4125_v7, 2  ;;  %v4134_v37 = vrot.slane %v4133_v24, 2 }
 0x81b   :  { %v4127_v51 = vadd.f32 %v4126_v33, %v4125_v7  ;;  %v4135_v32 = vadd.f32 %v4134_v37, %v4133_v24 }
 0x81d   :  { %v4128_v46 = vrot.slane %v4127_v51, 1  ;;  %v4136_v55 = vrot.slane %v4135_v32, 1 }
 0x81f   :  { %v4129_v34 = vadd.f32 %v4128_v46, %v4127_v51  ;;  %v4137_v25 = vadd.f32 %v4136_v55, %v4135_v32 }
 0x821   :  { %v4148_v20 = vadd.f32 %v4147_v3, %v4129_v34  ;;  %v4149_v43 = vadd.f32 %v4147_v3, %v4137_v25 }
 0x823   :  { %v4152_v57 = vcombine.low %v4148_v20, %v4149_v43 }
 0x825   :  { %v4159_v35 = vrot.slane %v4152_v57, %v4158_v15 }
 0x827   :  { %v4166_v27 = vrot.slane %v4159_v35, %v4158_v15 }
 0x829   :  { %4172 = vst.msk [vmem:[#allocation3] sm:$0x3] %vm4170_vm4, %v4166_v27 }
 0x82a   :  { %4750 = shalt.err (!%p4747_p4)
}
 0x82b   :  { %s4751_s6 = scalar_lea.hbm %s6472_s15, 32 }
 0x82c   :  { %p4752_p5 = scmp.ne.s32.totalorder %s6472_s15, %s4751_s6  ;;  %p4755_p6 = scmp.lt.u32.totalorder %s4751_s6, %s6472_s15 }
 0x82e   :  { %p4757_p7 = pnand %p4755_p6, %p4752_p5 }
 0x830   :  { %4760 = shalt.err (!%p4757_p7)
}
 0x831   :  { %4182 = dma.vmem_to_hbm [thread:$0]  %s4180_s12, 32, %s6472_s15, [#allocation4]  }
 0x832   :  { %4761 = dma.done.wait [#allocation4], 32  }
 0x833   :  { %4762 = vsyncadd [#allocation4], 4294967264 }
 0x834   :  { %4186 = vsyncpa [#allocation4], 1 }

</bundles_post_ra>
